<compile_context>
chip_gen: v6e
topology: v6e:2x2x1
jax: 0.10.0
libtpu: 0.0.40
codegen_flags: <defaults>
</compile_context>

<pallas_src>
import functools

import jax
import jax.numpy as jnp
from jax import lax
from jax.experimental import pallas as pl
from jax.experimental.pallas import tpu as pltpu


def _make_banded_conv_weight(w_khwio, w_dim):
    """w_khwio: (k, k, Cin, Cout) conv weight.  Returns (k, W*Cin, W*Cout).

    B[dy, w_in*C + ci, w_out*C + co] = w[dy, w_in - w_out + k//2, ci, co]
    (zero when the dx offset falls outside the kernel window), so that
        conv_out_rows = sum_dy  rows_shifted_by_(dy - k//2)(x) @ B[dy]
    reproduces the SAME-padded cross-correlation of nn.Conv2d / lax.conv in the
    lane-dense (H, W*C) layout.
    """
    k, _, c_in, c_out = w_khwio.shape
    p = k // 2
    w_in = jnp.arange(w_dim)[:, None]
    w_out = jnp.arange(w_dim)[None, :]
    dx = w_in - w_out + p                                   # (W, W)
    valid = (dx >= 0) & (dx < k)
    blocks = w_khwio[:, jnp.clip(dx, 0, k - 1)]             # (k, W, W, Cin, Cout)
    blocks = jnp.where(valid[None, :, :, None, None], blocks, 0.0)
    # (dy, w_in, ci, w_out, co) -> (k, W*Cin, W*Cout)
    return jnp.transpose(blocks, (0, 1, 3, 2, 4)).reshape(k, w_dim * c_in,
                                                          w_dim * c_out)


def rcab_kernel(x_ref, w1_ref, b1_ref, w2_ref, b2_ref,
                wd_ref, bd_ref, wu_ref, bu_ref, o_ref, *, k, C):
    """One (batch_tile) group of images per grid step, lane-dense everywhere.

    x_ref : (BT, H, W*C)   f32, lane-dense NHWC view of the input
    w1/w2 : (k, W*C, W*C)  bf16 block-banded conv weights (one mat per dy)
    b1/b2 : (1, W*C)       f32 lane-dense conv biases
    wd/bd : (C, Cr)/(1, Cr)   channel-attention squeeze, f32
    wu/bu : (Cr, C)/(1, C)    channel-attention excite, f32
    o_ref : (BT, H, W*C)   lane-dense output
    """
    BT, H, WC = x_ref.shape
    W = WC // C
    p = k // 2
    M = BT * H

    # Row-halo mask support (computed once; also handles image boundaries when
    # several images are folded into the matmul M dimension).
    row = lax.broadcasted_iota(jnp.int32, (M, WC), 0)
    h_local = jnp.mod(row, H)

    def conv_same(x_f32, w_ref, b_ref):
        """SAME kxk conv + bias on lane-dense (M, WC) activations as k
        full-width / full-depth MXU matmuls against block-banded weights."""
        acc = jnp.broadcast_to(b_ref[...], (M, WC))          # f32 bias init
        for dy in range(k):                                  # unrolled (k static)
            d = dy - p
            if d == 0:
                xs = x_f32
            else:
                # xs[r] = x[r + d] within the same image, 0 in the halo.
                xs = pltpu.roll(x_f32, (-d) % M, 0)          # XLU sublane roll
                ok = (h_local + d >= 0) & (h_local + d < H)
                xs = jnp.where(ok, xs, 0.0)
            acc = acc + jnp.dot(xs.astype(jnp.bfloat16), w_ref[dy],
                                preferred_element_type=jnp.float32)
        return acc

    x_dense = x_ref[...].reshape(M, WC)                      # f32, lane-dense

    # ---- conv1 -> ReLU -> conv2 (all in (M, W*C), f32 accumulation) ----
    a1 = jnp.maximum(conv_same(x_dense, w1_ref, b1_ref), 0.0)
    a2 = conv_same(a1, w2_ref, b2_ref)                       # (M, WC) f32

    # ---- channel attention: lane-dense pooling, tiny FCs, EUP sigmoid ----
    a2_img = a2.reshape(BT, H, WC)
    pool_h = jnp.sum(a2_img, axis=1)                         # (BT, WC) sublane reduce
    y = jnp.sum(pool_h.reshape(BT, W, C), axis=1) * (1.0 / (H * W))  # (BT, C)
    z = jnp.maximum(
        jnp.dot(y, wd_ref[...], preferred_element_type=jnp.float32)
        + bd_ref[...], 0.0)                                  # (BT, Cr)
    s = jax.nn.sigmoid(
        jnp.dot(z, wu_ref[...], preferred_element_type=jnp.float32)
        + bu_ref[...])                                       # (BT, C)

    # ---- gate + residual add, lane-dense (W*C lanes) -> unmasked stores ----
    s_dense = jnp.tile(s, (1, W))                            # (BT, W*C)
    x_res = x_ref[...]                                       # late residual reload
    o_ref[...] = (a2_img * s_dense[:, None, :] + x_res).astype(o_ref.dtype)


def rcab_forward(x_nchw, params, *, batch_tile=1):
    """RCAB forward. x_nchw: (N, C, H, W) float32.

    batch_tile=1 keeps a batch-parallel grid (both v7x TensorCores busy);
    batch_tile>=2 folds images into the matmul M dim to amortize per-step
    overhead on single-TC v5e/v6e.
    """
    x = jnp.transpose(x_nchw, (0, 2, 3, 1))                  # NCHW -> NHWC
    N, H, W, C = x.shape
    k = params["w1"].shape[0]
    Cr = params["wd"].shape[1]
    WC = W * C
    BT = batch_tile
    assert N % BT == 0

    # Lane-dense input view (free reshape in HBM).
    x_dense = x.reshape(N, H, WC)
    # Host-precomputed block-banded conv weights, bf16 for the MXU.
    w1b = _make_banded_conv_weight(params["w1"], W).astype(jnp.bfloat16)
    w2b = _make_banded_conv_weight(params["w2"], W).astype(jnp.bfloat16)
    # Lane-dense biases (b[c] replicated over the W pixel groups).
    b1d = jnp.tile(params["b1"], (1, W))                     # (1, W*C)
    b2d = jnp.tile(params["b2"], (1, W))

    kern = functools.partial(rcab_kernel, k=k, C=C)

    out_dense = pl.pallas_call(
        kern,
        out_shape=jax.ShapeDtypeStruct((N, H, WC), x.dtype),
        grid_spec=pltpu.PrefetchScalarGridSpec(
            num_scalar_prefetch=0,
            grid=(N // BT,),
            in_specs=[
                pl.BlockSpec((BT, H, WC), lambda n: (n, 0, 0)),   # x (lane-dense)
                pl.BlockSpec((k, WC, WC), lambda n: (0, 0, 0)),   # w1 banded bf16
                pl.BlockSpec((1, WC), lambda n: (0, 0)),          # b1 lane-dense
                pl.BlockSpec((k, WC, WC), lambda n: (0, 0, 0)),   # w2 banded bf16
                pl.BlockSpec((1, WC), lambda n: (0, 0)),          # b2 lane-dense
                pl.BlockSpec((C, Cr), lambda n: (0, 0)),          # wd
                pl.BlockSpec((1, Cr), lambda n: (0, 0)),          # bd
                pl.BlockSpec((Cr, C), lambda n: (0, 0)),          # wu
                pl.BlockSpec((1, C), lambda n: (0, 0)),           # bu
            ],
            out_specs=pl.BlockSpec((BT, H, WC), lambda n: (n, 0, 0)),
        ),
        compiler_params=pltpu.CompilerParams(
            dimension_semantics=("parallel",)),
    )(x_dense, w1b, b1d, w2b, b2d,
      params["wd"], params["bd"], params["wu"], params["bu"])

    out = out_dense.reshape(N, H, W, C)
    return jnp.transpose(out, (0, 3, 1, 2))                  # back to NCHW


def rcab_reference(x_nchw, params):
    """Plain-JAX f32 reference matching the PyTorch module (NCHW)."""
    def conv2d(x, w_khwio, b):
        w = jnp.transpose(w_khwio, (3, 2, 0, 1))             # -> OIHW
        y = lax.conv_general_dilated(
            x, w, window_strides=(1, 1), padding="SAME",
            dimension_numbers=("NCHW", "OIHW", "NCHW"))
        return y + b.reshape(1, -1, 1, 1)

    h = jnp.maximum(conv2d(x_nchw, params["w1"], params["b1"]), 0.0)
    h2 = conv2d(h, params["w2"], params["b2"])
    y = jnp.mean(h2, axis=(2, 3), keepdims=True)             # (N, C, 1, 1)
    z = jnp.maximum(
        jnp.einsum("ncij,cd->ndij", y, params["wd"])
        + params["bd"].reshape(1, -1, 1, 1), 0.0)
    s = jax.nn.sigmoid(
        jnp.einsum("ndij,dc->ncij", z, params["wu"])
        + params["bu"].reshape(1, -1, 1, 1))
    return h2 * s + x_nchw


def make_params(key, n_feat, kernel_size, reduction):
    ks = jax.random.split(key, 8)
    c, k, cr = n_feat, kernel_size, n_feat // reduction
    scale_conv = 1.0 / (c * k * k) ** 0.5
    return {
        "w1": jax.random.normal(ks[0], (k, k, c, c), jnp.float32) * scale_conv,
        "b1": jax.random.normal(ks[1], (1, c), jnp.float32) * 0.01,
        "w2": jax.random.normal(ks[2], (k, k, c, c), jnp.float32) * scale_conv,
        "b2": jax.random.normal(ks[3], (1, c), jnp.float32) * 0.01,
        "wd": jax.random.normal(ks[4], (c, cr), jnp.float32) / c ** 0.5,
        "bd": jax.random.normal(ks[5], (1, cr), jnp.float32) * 0.01,
        "wu": jax.random.normal(ks[6], (cr, c), jnp.float32) / cr ** 0.5,
        "bu": jax.random.normal(ks[7], (1, c), jnp.float32) * 0.01,
    }


if __name__ == "__main__":
    # RCAB(conv, n_feat=16, kernel_size=3, reduction=4)
    N, C, H, W = 2, 16, 16, 16
    kernel_size, reduction = 3, 4

    key = jax.random.PRNGKey(0)
    k_x, k_p = jax.random.split(key)
    x = jax.random.normal(k_x, (N, C, H, W), jnp.float32)
    params = make_params(k_p, C, kernel_size, reduction)

    out = rcab_forward(x, params, batch_tile=1)
    out = jax.block_until_ready(out)

    ref = rcab_reference(x, params)
    assert out.shape == ref.shape == (N, C, H, W)
    # Tolerance reflects bf16 MXU operands (f32 accumulation) in the two 3x3
    # convs; observed error is O(1e-2) absolute on O(1) activations.
    assert jnp.allclose(out, ref, atol=5e-2, rtol=5e-2), (
        float(jnp.max(jnp.abs(out - ref))))

    print("KERNEL_OK")
</pallas_src>

<mosaic_0001>
module attributes {stable_mosaic.version = 11 : i64} {
  func.func @rcab_kernel(%arg0: i32, %arg1: memref<1x16x256xf32, #tpu.memory_space<vmem>>, %arg2: memref<3x256x256xbf16, #tpu.memory_space<vmem>>, %arg3: memref<1x256xf32, #tpu.memory_space<vmem>>, %arg4: memref<3x256x256xbf16, #tpu.memory_space<vmem>>, %arg5: memref<1x256xf32, #tpu.memory_space<vmem>>, %arg6: memref<16x4xf32, #tpu.memory_space<vmem>>, %arg7: memref<1x4xf32, #tpu.memory_space<vmem>>, %arg8: memref<4x16xf32, #tpu.memory_space<vmem>>, %arg9: memref<1x16xf32, #tpu.memory_space<vmem>>, %arg10: memref<1x16x256xf32, #tpu.memory_space<vmem>>) attributes {dimension_semantics = [#tpu.dimension_semantics<parallel>], iteration_bounds = array<i64: 2>, scalar_prefetch = 0 : i64, scratch_operands = 0 : i64, tpu.core_type = #tpu.core_type<tc>, window_params = [{transform_indices = @transform_0, window_bounds = array<i64: 1, 16, 256>}, {pipeline_mode = #tpu.pipeline_mode<synchronous>, transform_indices = @transform_1, window_bounds = array<i64: 3, 256, 256>}, {pipeline_mode = #tpu.pipeline_mode<synchronous>, transform_indices = @transform_2, window_bounds = array<i64: 1, 256>}, {pipeline_mode = #tpu.pipeline_mode<synchronous>, transform_indices = @transform_3, window_bounds = array<i64: 3, 256, 256>}, {pipeline_mode = #tpu.pipeline_mode<synchronous>, transform_indices = @transform_4, window_bounds = array<i64: 1, 256>}, {pipeline_mode = #tpu.pipeline_mode<synchronous>, transform_indices = @transform_5, window_bounds = array<i64: 16, 4>}, {pipeline_mode = #tpu.pipeline_mode<synchronous>, transform_indices = @transform_6, window_bounds = array<i64: 1, 4>}, {pipeline_mode = #tpu.pipeline_mode<synchronous>, transform_indices = @transform_7, window_bounds = array<i64: 4, 16>}, {pipeline_mode = #tpu.pipeline_mode<synchronous>, transform_indices = @transform_8, window_bounds = array<i64: 1, 16>}, {transform_indices = @transform_9, window_bounds = array<i64: 1, 16, 256>}]} {
    %0 = tpu.iota {dimensions = array<i32: 0>} : vector<16x256xi32>
    %c16_i32 = arith.constant 16 : i32
    %c0_i32 = arith.constant 0 : i32
    %1 = arith.cmpi eq, %c16_i32, %c0_i32 : i32
    %c1_i32 = arith.constant 1 : i32
    %2 = arith.select %1, %c1_i32, %c16_i32 : i32
    %3 = vector.broadcast %2 : i32 to vector<16x256xi32>
    %4 = arith.remsi %0, %3 : vector<16x256xi32>
    %c0_i32_0 = arith.constant 0 : i32
    %5 = vector.broadcast %c0_i32_0 : i32 to vector<16x256xi32>
    %6 = arith.cmpi ne, %4, %5 : vector<16x256xi32>
    %c0_i32_1 = arith.constant 0 : i32
    %7 = vector.broadcast %c0_i32_1 : i32 to vector<16x256xi32>
    %8 = arith.cmpi slt, %4, %7 : vector<16x256xi32>
    %c0_i32_2 = arith.constant 0 : i32
    %9 = arith.cmpi slt, %2, %c0_i32_2 : i32
    %10 = vector.broadcast %9 : i1 to vector<16x256xi1>
    %11 = vector.broadcast %10 : vector<16x256xi1> to vector<16x256xi1>
    %12 = arith.xori %8, %11 : vector<16x256xi1>
    %13 = arith.andi %12, %6 : vector<16x256xi1>
    %14 = vector.broadcast %2 : i32 to vector<16x256xi32>
    %15 = arith.addi %4, %14 : vector<16x256xi32>
    %16 = arith.select %13, %15, %4 : vector<16x256xi1>, vector<16x256xi32>
    %c0 = arith.constant 0 : index
    %c0_3 = arith.constant 0 : index
    %c0_4 = arith.constant 0 : index
    %17 = vector.load %arg1[%c0, %c0_3, %c0_4] : memref<1x16x256xf32, #tpu.memory_space<vmem>>, vector<1x16x256xf32>
    %18 = vector.shape_cast %17 : vector<1x16x256xf32> to vector<16x256xf32>
    %c0_5 = arith.constant 0 : index
    %c0_6 = arith.constant 0 : index
    %19 = vector.load %arg3[%c0_5, %c0_6] : memref<1x256xf32, #tpu.memory_space<vmem>>, vector<1x256xf32>
    %20 = vector.shape_cast %19 : vector<1x256xf32> to vector<1x256xf32>
    %21 = vector.broadcast %20 : vector<1x256xf32> to vector<16x256xf32>
    %c1_i32_7 = arith.constant 1 : i32
    %22 = tpu.dynamic_rotate %18 by %c1_i32_7 dim 0 : vector<16x256xf32>, i32 -> vector<16x256xf32>
    %c-1_i32 = arith.constant -1 : i32
    %23 = vector.broadcast %c-1_i32 : i32 to vector<16x256xi32>
    %24 = arith.addi %16, %23 : vector<16x256xi32>
    %c0_i32_8 = arith.constant 0 : i32
    %25 = vector.broadcast %c0_i32_8 : i32 to vector<16x256xi32>
    %26 = arith.cmpi sge, %24, %25 : vector<16x256xi32>
    %c-1_i32_9 = arith.constant -1 : i32
    %27 = vector.broadcast %c-1_i32_9 : i32 to vector<16x256xi32>
    %28 = arith.addi %16, %27 : vector<16x256xi32>
    %c16_i32_10 = arith.constant 16 : i32
    %29 = vector.broadcast %c16_i32_10 : i32 to vector<16x256xi32>
    %30 = arith.cmpi slt, %28, %29 : vector<16x256xi32>
    %31 = arith.andi %26, %30 : vector<16x256xi1>
    %cst = arith.constant 0.000000e+00 : f32
    %32 = vector.broadcast %cst : f32 to vector<16x256xf32>
    %33 = arith.select %31, %22, %32 : vector<16x256xi1>, vector<16x256xf32>
    %34 = arith.truncf %33 : vector<16x256xf32> to vector<16x256xbf16>
    %c0_11 = arith.constant 0 : index
    %c0_12 = arith.constant 0 : index
    %c0_13 = arith.constant 0 : index
    %35 = vector.load %arg2[%c0_11, %c0_12, %c0_13] : memref<3x256x256xbf16, #tpu.memory_space<vmem>>, vector<1x256x256xbf16>
    %36 = vector.shape_cast %35 : vector<1x256x256xbf16> to vector<256x256xbf16>
    %cst_14 = arith.constant dense<0.000000e+00> : vector<16x256xf32>
    %37 = tpu.matmul %34, %36, %cst_14 {dimension_numbers = #tpu.dot_dimension_numbers<[1], [0], [0], [1], [0, 0, 1, 1], [], []>} : vector<16x256xbf16>, vector<256x256xbf16>, vector<16x256xf32> -> vector<16x256xf32>
    %38 = arith.addf %21, %37 : vector<16x256xf32>
    %39 = arith.truncf %18 : vector<16x256xf32> to vector<16x256xbf16>
    %c1 = arith.constant 1 : index
    %c0_15 = arith.constant 0 : index
    %c0_16 = arith.constant 0 : index
    %40 = vector.load %arg2[%c1, %c0_15, %c0_16] : memref<3x256x256xbf16, #tpu.memory_space<vmem>>, vector<1x256x256xbf16>
    %41 = vector.shape_cast %40 : vector<1x256x256xbf16> to vector<256x256xbf16>
    %cst_17 = arith.constant dense<0.000000e+00> : vector<16x256xf32>
    %42 = tpu.matmul %39, %41, %cst_17 {dimension_numbers = #tpu.dot_dimension_numbers<[1], [0], [0], [1], [0, 0, 1, 1], [], []>} : vector<16x256xbf16>, vector<256x256xbf16>, vector<16x256xf32> -> vector<16x256xf32>
    %43 = arith.addf %38, %42 : vector<16x256xf32>
    %c15_i32 = arith.constant 15 : i32
    %44 = tpu.dynamic_rotate %18 by %c15_i32 dim 0 : vector<16x256xf32>, i32 -> vector<16x256xf32>
    %c1_i32_18 = arith.constant 1 : i32
    %45 = vector.broadcast %c1_i32_18 : i32 to vector<16x256xi32>
    %46 = arith.addi %16, %45 : vector<16x256xi32>
    %c0_i32_19 = arith.constant 0 : i32
    %47 = vector.broadcast %c0_i32_19 : i32 to vector<16x256xi32>
    %48 = arith.cmpi sge, %46, %47 : vector<16x256xi32>
    %c1_i32_20 = arith.constant 1 : i32
    %49 = vector.broadcast %c1_i32_20 : i32 to vector<16x256xi32>
    %50 = arith.addi %16, %49 : vector<16x256xi32>
    %c16_i32_21 = arith.constant 16 : i32
    %51 = vector.broadcast %c16_i32_21 : i32 to vector<16x256xi32>
    %52 = arith.cmpi slt, %50, %51 : vector<16x256xi32>
    %53 = arith.andi %48, %52 : vector<16x256xi1>
    %cst_22 = arith.constant 0.000000e+00 : f32
    %54 = vector.broadcast %cst_22 : f32 to vector<16x256xf32>
    %55 = arith.select %53, %44, %54 : vector<16x256xi1>, vector<16x256xf32>
    %56 = arith.truncf %55 : vector<16x256xf32> to vector<16x256xbf16>
    %c2 = arith.constant 2 : index
    %c0_23 = arith.constant 0 : index
    %c0_24 = arith.constant 0 : index
    %57 = vector.load %arg2[%c2, %c0_23, %c0_24] : memref<3x256x256xbf16, #tpu.memory_space<vmem>>, vector<1x256x256xbf16>
    %58 = vector.shape_cast %57 : vector<1x256x256xbf16> to vector<256x256xbf16>
    %cst_25 = arith.constant dense<0.000000e+00> : vector<16x256xf32>
    %59 = tpu.matmul %56, %58, %cst_25 {dimension_numbers = #tpu.dot_dimension_numbers<[1], [0], [0], [1], [0, 0, 1, 1], [], []>} : vector<16x256xbf16>, vector<256x256xbf16>, vector<16x256xf32> -> vector<16x256xf32>
    %60 = arith.addf %43, %59 : vector<16x256xf32>
    %cst_26 = arith.constant 0.000000e+00 : f32
    %61 = vector.broadcast %cst_26 : f32 to vector<16x256xf32>
    %62 = arith.maximumf %60, %61 : vector<16x256xf32>
    %c0_27 = arith.constant 0 : index
    %c0_28 = arith.constant 0 : index
    %63 = vector.load %arg5[%c0_27, %c0_28] : memref<1x256xf32, #tpu.memory_space<vmem>>, vector<1x256xf32>
    %64 = vector.shape_cast %63 : vector<1x256xf32> to vector<1x256xf32>
    %65 = vector.broadcast %64 : vector<1x256xf32> to vector<16x256xf32>
    %c1_i32_29 = arith.constant 1 : i32
    %66 = tpu.dynamic_rotate %62 by %c1_i32_29 dim 0 : vector<16x256xf32>, i32 -> vector<16x256xf32>
    %c-1_i32_30 = arith.constant -1 : i32
    %67 = vector.broadcast %c-1_i32_30 : i32 to vector<16x256xi32>
    %68 = arith.addi %16, %67 : vector<16x256xi32>
    %c0_i32_31 = arith.constant 0 : i32
    %69 = vector.broadcast %c0_i32_31 : i32 to vector<16x256xi32>
    %70 = arith.cmpi sge, %68, %69 : vector<16x256xi32>
    %c-1_i32_32 = arith.constant -1 : i32
    %71 = vector.broadcast %c-1_i32_32 : i32 to vector<16x256xi32>
    %72 = arith.addi %16, %71 : vector<16x256xi32>
    %c16_i32_33 = arith.constant 16 : i32
    %73 = vector.broadcast %c16_i32_33 : i32 to vector<16x256xi32>
    %74 = arith.cmpi slt, %72, %73 : vector<16x256xi32>
    %75 = arith.andi %70, %74 : vector<16x256xi1>
    %cst_34 = arith.constant 0.000000e+00 : f32
    %76 = vector.broadcast %cst_34 : f32 to vector<16x256xf32>
    %77 = arith.select %75, %66, %76 : vector<16x256xi1>, vector<16x256xf32>
    %78 = arith.truncf %77 : vector<16x256xf32> to vector<16x256xbf16>
    %c0_35 = arith.constant 0 : index
    %c0_36 = arith.constant 0 : index
    %c0_37 = arith.constant 0 : index
    %79 = vector.load %arg4[%c0_35, %c0_36, %c0_37] : memref<3x256x256xbf16, #tpu.memory_space<vmem>>, vector<1x256x256xbf16>
    %80 = vector.shape_cast %79 : vector<1x256x256xbf16> to vector<256x256xbf16>
    %cst_38 = arith.constant dense<0.000000e+00> : vector<16x256xf32>
    %81 = tpu.matmul %78, %80, %cst_38 {dimension_numbers = #tpu.dot_dimension_numbers<[1], [0], [0], [1], [0, 0, 1, 1], [], []>} : vector<16x256xbf16>, vector<256x256xbf16>, vector<16x256xf32> -> vector<16x256xf32>
    %82 = arith.addf %65, %81 : vector<16x256xf32>
    %83 = arith.truncf %62 : vector<16x256xf32> to vector<16x256xbf16>
    %c1_39 = arith.constant 1 : index
    %c0_40 = arith.constant 0 : index
    %c0_41 = arith.constant 0 : index
    %84 = vector.load %arg4[%c1_39, %c0_40, %c0_41] : memref<3x256x256xbf16, #tpu.memory_space<vmem>>, vector<1x256x256xbf16>
    %85 = vector.shape_cast %84 : vector<1x256x256xbf16> to vector<256x256xbf16>
    %cst_42 = arith.constant dense<0.000000e+00> : vector<16x256xf32>
    %86 = tpu.matmul %83, %85, %cst_42 {dimension_numbers = #tpu.dot_dimension_numbers<[1], [0], [0], [1], [0, 0, 1, 1], [], []>} : vector<16x256xbf16>, vector<256x256xbf16>, vector<16x256xf32> -> vector<16x256xf32>
    %87 = arith.addf %82, %86 : vector<16x256xf32>
    %c15_i32_43 = arith.constant 15 : i32
    %88 = tpu.dynamic_rotate %62 by %c15_i32_43 dim 0 : vector<16x256xf32>, i32 -> vector<16x256xf32>
    %c1_i32_44 = arith.constant 1 : i32
    %89 = vector.broadcast %c1_i32_44 : i32 to vector<16x256xi32>
    %90 = arith.addi %16, %89 : vector<16x256xi32>
    %c0_i32_45 = arith.constant 0 : i32
    %91 = vector.broadcast %c0_i32_45 : i32 to vector<16x256xi32>
    %92 = arith.cmpi sge, %90, %91 : vector<16x256xi32>
    %c1_i32_46 = arith.constant 1 : i32
    %93 = vector.broadcast %c1_i32_46 : i32 to vector<16x256xi32>
    %94 = arith.addi %16, %93 : vector<16x256xi32>
    %c16_i32_47 = arith.constant 16 : i32
    %95 = vector.broadcast %c16_i32_47 : i32 to vector<16x256xi32>
    %96 = arith.cmpi slt, %94, %95 : vector<16x256xi32>
    %97 = arith.andi %92, %96 : vector<16x256xi1>
    %cst_48 = arith.constant 0.000000e+00 : f32
    %98 = vector.broadcast %cst_48 : f32 to vector<16x256xf32>
    %99 = arith.select %97, %88, %98 : vector<16x256xi1>, vector<16x256xf32>
    %100 = arith.truncf %99 : vector<16x256xf32> to vector<16x256xbf16>
    %c2_49 = arith.constant 2 : index
    %c0_50 = arith.constant 0 : index
    %c0_51 = arith.constant 0 : index
    %101 = vector.load %arg4[%c2_49, %c0_50, %c0_51] : memref<3x256x256xbf16, #tpu.memory_space<vmem>>, vector<1x256x256xbf16>
    %102 = vector.shape_cast %101 : vector<1x256x256xbf16> to vector<256x256xbf16>
    %cst_52 = arith.constant dense<0.000000e+00> : vector<16x256xf32>
    %103 = tpu.matmul %100, %102, %cst_52 {dimension_numbers = #tpu.dot_dimension_numbers<[1], [0], [0], [1], [0, 0, 1, 1], [], []>} : vector<16x256xbf16>, vector<256x256xbf16>, vector<16x256xf32> -> vector<16x256xf32>
    %104 = arith.addf %87, %103 : vector<16x256xf32>
    %105 = vector.shape_cast %104 : vector<16x256xf32> to vector<1x16x256xf32>
    %cst_53 = arith.constant dense<0.000000e+00> : vector<1x256xf32>
    %106 = vector.multi_reduction <add>, %105, %cst_53 [1] : vector<1x16x256xf32> to vector<1x256xf32>
    %107 = vector.shape_cast %106 : vector<1x256xf32> to vector<1x16x16xf32>
    %cst_54 = arith.constant dense<0.000000e+00> : vector<1x16xf32>
    %108 = vector.multi_reduction <add>, %107, %cst_54 [1] : vector<1x16x16xf32> to vector<1x16xf32>
    %cst_55 = arith.constant 3.906250e-03 : f32
    %109 = vector.broadcast %cst_55 : f32 to vector<1x16xf32>
    %110 = arith.mulf %108, %109 : vector<1x16xf32>
    %c0_56 = arith.constant 0 : index
    %c0_57 = arith.constant 0 : index
    %111 = vector.load %arg6[%c0_56, %c0_57] : memref<16x4xf32, #tpu.memory_space<vmem>>, vector<16x4xf32>
    %cst_58 = arith.constant dense<0.000000e+00> : vector<1x4xf32>
    %112 = tpu.matmul %110, %111, %cst_58 {dimension_numbers = #tpu.dot_dimension_numbers<[1], [0], [0], [1], [0, 0, 1, 1], [], []>} : vector<1x16xf32>, vector<16x4xf32>, vector<1x4xf32> -> vector<1x4xf32>
    %c0_59 = arith.constant 0 : index
    %c0_60 = arith.constant 0 : index
    %113 = vector.load %arg7[%c0_59, %c0_60] : memref<1x4xf32, #tpu.memory_space<vmem>>, vector<1x4xf32>
    %114 = arith.addf %112, %113 : vector<1x4xf32>
    %cst_61 = arith.constant 0.000000e+00 : f32
    %115 = vector.broadcast %cst_61 : f32 to vector<1x4xf32>
    %116 = arith.maximumf %114, %115 : vector<1x4xf32>
    %c0_62 = arith.constant 0 : index
    %c0_63 = arith.constant 0 : index
    %117 = vector.load %arg8[%c0_62, %c0_63] : memref<4x16xf32, #tpu.memory_space<vmem>>, vector<4x16xf32>
    %cst_64 = arith.constant dense<0.000000e+00> : vector<1x16xf32>
    %118 = tpu.matmul %116, %117, %cst_64 {dimension_numbers = #tpu.dot_dimension_numbers<[1], [0], [0], [1], [0, 0, 1, 1], [], []>} : vector<1x4xf32>, vector<4x16xf32>, vector<1x16xf32> -> vector<1x16xf32>
    %c0_65 = arith.constant 0 : index
    %c0_66 = arith.constant 0 : index
    %119 = vector.load %arg9[%c0_65, %c0_66] : memref<1x16xf32, #tpu.memory_space<vmem>>, vector<1x16xf32>
    %120 = arith.addf %118, %119 : vector<1x16xf32>
    %121 = arith.negf %120 : vector<1x16xf32>
    %122 = math.exp %121 : vector<1x16xf32>
    %cst_67 = arith.constant 1.000000e+00 : f32
    %123 = vector.broadcast %cst_67 : f32 to vector<1x16xf32>
    %124 = arith.addf %123, %122 : vector<1x16xf32>
    %125 = arith.divf %123, %124 : vector<1x16xf32>
    %126 = tpu.concatenate %125, %125, %125, %125, %125, %125, %125, %125, %125, %125, %125, %125, %125, %125, %125, %125 in 1 : vector<1x16xf32>, vector<1x16xf32>, vector<1x16xf32>, vector<1x16xf32>, vector<1x16xf32>, vector<1x16xf32>, vector<1x16xf32>, vector<1x16xf32>, vector<1x16xf32>, vector<1x16xf32>, vector<1x16xf32>, vector<1x16xf32>, vector<1x16xf32>, vector<1x16xf32>, vector<1x16xf32>, vector<1x16xf32> -> vector<1x256xf32>
    %c0_68 = arith.constant 0 : index
    %c0_69 = arith.constant 0 : index
    %c0_70 = arith.constant 0 : index
    %127 = vector.load %arg1[%c0_68, %c0_69, %c0_70] : memref<1x16x256xf32, #tpu.memory_space<vmem>>, vector<1x16x256xf32>
    %128 = vector.shape_cast %126 : vector<1x256xf32> to vector<1x1x256xf32>
    %129 = vector.broadcast %128 : vector<1x1x256xf32> to vector<1x16x256xf32>
    %130 = arith.mulf %105, %129 : vector<1x16x256xf32>
    %131 = arith.addf %130, %127 : vector<1x16x256xf32>
    %c0_71 = arith.constant 0 : index
    %c0_72 = arith.constant 0 : index
    %c0_73 = arith.constant 0 : index
    %132 = vector.load %arg10[%c0_71, %c0_72, %c0_73] : memref<1x16x256xf32, #tpu.memory_space<vmem>>, vector<1x16x256xf32>
    tpu.vector_store %arg10[%c0_71, %c0_72, %c0_73], %131 {strides = array<i32>} : memref<1x16x256xf32, #tpu.memory_space<vmem>>, vector<1x16x256xf32>,
    return
  }
  func.func @transform_0(%arg0: i32) -> (i32, i32, i32) {
    %c0_i32 = arith.constant 0 : i32
    %c0_i32_0 = arith.constant 0 : i32
    %c0_i32_1 = arith.constant 0 : i32
    return %arg0, %c0_i32, %c0_i32_0 : i32, i32, i32
  }
  func.func @transform_1(%arg0: i32) -> (i32, i32, i32) {
    %c0_i32 = arith.constant 0 : i32
    %c0_i32_0 = arith.constant 0 : i32
    %c0_i32_1 = arith.constant 0 : i32
    %c0_i32_2 = arith.constant 0 : i32
    return %c0_i32, %c0_i32_0, %c0_i32_1 : i32, i32, i32
  }
  func.func @transform_2(%arg0: i32) -> (i32, i32) {
    %c0_i32 = arith.constant 0 : i32
    %c0_i32_0 = arith.constant 0 : i32
    %c0_i32_1 = arith.constant 0 : i32
    return %c0_i32, %c0_i32_0 : i32, i32
  }
  func.func @transform_3(%arg0: i32) -> (i32, i32, i32) {
    %c0_i32 = arith.constant 0 : i32
    %c0_i32_0 = arith.constant 0 : i32
    %c0_i32_1 = arith.constant 0 : i32
    %c0_i32_2 = arith.constant 0 : i32
    return %c0_i32, %c0_i32_0, %c0_i32_1 : i32, i32, i32
  }
  func.func @transform_4(%arg0: i32) -> (i32, i32) {
    %c0_i32 = arith.constant 0 : i32
    %c0_i32_0 = arith.constant 0 : i32
    %c0_i32_1 = arith.constant 0 : i32
    return %c0_i32, %c0_i32_0 : i32, i32
  }
  func.func @transform_5(%arg0: i32) -> (i32, i32) {
    %c0_i32 = arith.constant 0 : i32
    %c0_i32_0 = arith.constant 0 : i32
    %c0_i32_1 = arith.constant 0 : i32
    return %c0_i32, %c0_i32_0 : i32, i32
  }
  func.func @transform_6(%arg0: i32) -> (i32, i32) {
    %c0_i32 = arith.constant 0 : i32
    %c0_i32_0 = arith.constant 0 : i32
    %c0_i32_1 = arith.constant 0 : i32
    return %c0_i32, %c0_i32_0 : i32, i32
  }
  func.func @transform_7(%arg0: i32) -> (i32, i32) {
    %c0_i32 = arith.constant 0 : i32
    %c0_i32_0 = arith.constant 0 : i32
    %c0_i32_1 = arith.constant 0 : i32
    return %c0_i32, %c0_i32_0 : i32, i32
  }
  func.func @transform_8(%arg0: i32) -> (i32, i32) {
    %c0_i32 = arith.constant 0 : i32
    %c0_i32_0 = arith.constant 0 : i32
    %c0_i32_1 = arith.constant 0 : i32
    return %c0_i32, %c0_i32_0 : i32, i32
  }
  func.func @transform_9(%arg0: i32) -> (i32, i32, i32) {
    %c0_i32 = arith.constant 0 : i32
    %c0_i32_0 = arith.constant 0 : i32
    %c0_i32_1 = arith.constant 0 : i32
    return %arg0, %c0_i32, %c0_i32_0 : i32, i32, i32
  }
}

</mosaic_0001>

<bundles_post_ra>
// kernel: tpu_custom_call.1
= control target key start
LH: loop header
LB: loop body
LE: loop exit
PB: predicated region body
PF: predicated region fallthrough
CT: control target
= control target key end

     0   :  { %s3681_s0 = inlined_call_operand.hbm [shape: f32[2,16,256], index: 0, kind: input, shape index: {}]   ;;  %s3682_s1 = inlined_call_operand.hbm [shape: bf16[3,256,256], index: 1, kind: input, shape index: {}]   ;;  %s3683_s2 = inlined_call_operand.vmem [shape: f32[1,256], index: 2, kind: input, shape index: {}]   ;;  %s3684_s3 = inlined_call_operand.hbm [shape: bf16[3,256,256], index: 3, kind: input, shape index: {}]   ;;  %s3685_s4 = inlined_call_operand.vmem [shape: f32[1,256], index: 4, kind: input, shape index: {}]   ;;  %s3686_s5 = inlined_call_operand.vmem [shape: f32[16,4], index: 5, kind: input, shape index: {}]   ;;  %s3687_s6 = inlined_call_operand.vmem [shape: f32[1,4], index: 6, kind: input, shape index: {}]   ;;  %s3688_s7 = inlined_call_operand.vmem [shape: f32[4,16], index: 7, kind: input, shape index: {}]   ;;  %s3689_s8 = inlined_call_operand.vmem [shape: f32[1,16], index: 8, kind: input, shape index: {}]   ;;  %s3690_s9 = inlined_call_operand.hbm [shape: f32[2,16,256], index: 9, kind: output, shape index: {}]  }
   0x1   :  { %3695 = sst [smem:[#allocation13_spill]] %s3682_s1 }
   0x2   :  { %3696 = sst [smem:[#allocation14_spill]] %s3684_s3 }
   0x3   :  { %14 = vsyncpa [#allocation3], 0 }
   0x4   :  { %16 = vsyncpa [#allocation3 + $0x1], 0 }
   0x5   :  { %17 = vsyncpa [#allocation6], 0 }
   0x6   :  { %18 = vsyncpa [#allocation4], 0 }
   0x7   :  { %20 = vsyncpa [#allocation4 + $0x1], 0  ;;  %s3300_s30 = smov 0   ;;  %s3302_s10 = smov 0  }
   0x8   :  { %s3304_s11 = smov 0   ;;  %s3306_s12 = smov 0  }
   0x9 LB: > { %s3321_s13 = sadd.s32 4294967295, %s3227_s12   ;;  %s2442_s14 = sadd.s32 4294967294, %s3227_s12   ;;  %s3227_s12 = sphi %s3306_s12, %s3722_s12   ;;  %s3223_s11 = sphi %s3304_s11, %s3721_s11   ;;  %s3219_s10 = sphi %s3302_s10, %s3720_s10   ;;  %s3215_s30 = sphi %s3300_s30, %s3719_s30  }
   0xa   : > { %p46_p0 = scmp.ne.s32.totalorder %s3219_s10, %s3215_s30  ;;  %p3691_p1 = scmp.eq.s32.totalorder %s3321_s13, 0 }
   0xb   : > { %p244_p3 = scmp.eq.s32.totalorder %s2442_s14, 1  ;;  %p2443_p5 = scmp.ge.s32.totalorder %s3227_s12, 1 }
   0xc   : > { %p3330_p4 = por %p3691_p1, %p46_p0  ;;  %p251_p7 = scmp.lt.s32.totalorder %s3227_s12, 3 }
   0xd   : > { %p3335_p6 = por %p244_p3, %p46_p0  ;;  %s3229_s18 = smov [#allocation5]  }
   0xe   : > { %s3697_s15 = scalar_select %p3330_p4, 1, 0 }
   0xf   : > { %s3698_s16 = scalar_select %p3335_p6, 1, 0 }
  0x10   : > { %p3340_p8 = pnand %p2443_p5, %p251_p7  ;;  %s263_s19 = sshll.u32 %s3229_s18, 4  ;;  %s264_s19 = int_to_ptr.vmem [resolvable:$true] %s263_s19 }
  0x11   : > { %s3230_s21 = smov [#allocation7]   ;;  %s3090_s23 = scalar_lea.vmem %s264_s19, 12288 }
  0x12   : > { %s3699_s17 = scalar_select %p3340_p8, 1, 0 }
  0x13   : > { %p2711_p9 = pneg %p3340_p8  ;;  %s279_s22 = sshll.u32 %s3230_s21, 4  ;;  %s280_s22 = int_to_ptr.vmem [resolvable:$true] %s279_s22 }
  0x14   : > { %p3091_p13 = scmp.ne.s32.totalorder %s264_s19, %s3090_s23  ;;  %p3098_p5 = scmp.lt.s32.totalorder %s264_s19, %s264_s19 }
  0x15   : > { %p3349_p11 = pnand %p2711_p9, %p3691_p1  ;;  %p3099_p7 = scmp.lt.s32.totalorder %s3090_s23, %s3090_s23 }
  0x17   : > { %p3081_p12 = pneg %p3349_p11  ;;  %p3100_p10 = por %p3099_p7, %p3098_p5 }
  0x19   : > { %p3093_p0 = pnand %p3091_p13, %p3081_p12 }
  0x1b   : > { %p3094_p3 = pneg %p3093_p0 }
  0x1d   : > { %p3101_p9 = pnand %p3100_p10, %p3094_p3 }
  0x1f   : > { %3104 = shalt.err (!%p3101_p9)
}
  0x20   : > { %s3231_s24 = smov 128   ;;  %s3232_s25 = smov 8  }
  0x21   : > { %s3701_s1 = sld [smem:[#allocation13_spill]]  ;;  %s3116_s28 = scalar_lea.vmem %s280_s22, 12288 }
  0x22   : > { %p3117_p1 = scmp.ne.s32.totalorder %s280_s22, %s3116_s28  ;;  %p3124_p2 = scmp.lt.s32.totalorder %s280_s22, %s280_s22 }
  0x23   : > { %p3125_p6 = scmp.lt.s32.totalorder %s3116_s28, %s3116_s28 }
  0x24   : > { %p3119_p13 = pnand %p3117_p1, %p3081_p12 }
  0x25   : > { %p3126_p5 = por %p3125_p6, %p3124_p2 }
  0x26   : > { %p3120_p0 = pneg %p3119_p13 }
  0x27   : > { %2714 = dma.hbm_to_vmem [thread:$0]  (!%p3349_p11), %s3701_s1, 12288, %s264_s19, [#allocation6], %s3231_s24, %s3231_s24, %s3232_s25  }
  0x28   : > { %p3127_p10 = pnand %p3126_p5, %p3120_p0 }
  0x2a   : > { %3130 = shalt.err (!%p3127_p10)
}
  0x2b   : > { %s3702_s3 = sld [smem:[#allocation14_spill]]  ;;  %s3372_s18 = sadd.s32 1, %s3227_s12  }
  0x2c   : > { %s33_s19 = sadd.s32 1, %s3223_s11  ;;  %s30_s20 = ssub.s32 %s3227_s12, %s3372_s18 }
  0x2d   : > { %p40_p1 = scmp.ne.s32.totalorder %s3223_s11, %s3219_s10  ;;  %p31_p2 = scmp.eq.s32.totalorder %s30_s20, 0 }
  0x2e   : > { %p41_p6 = scmp.eq.s32.totalorder %s3227_s12, 0  ;;  %p3703_p12 = scmp.eq.s32.totalorder %s3321_s13, 1 }
  0x2f   : > { %p2728_p7 = scmp.lt.s32.totalorder %s3227_s12, 2  ;;  %s308_s26 = sand.u32 1, %s3223_s11  }
  0x30   : > { %p3382_p3 = por %p3703_p12, %p40_p1  ;;  %p42_p9 = por %p41_p6, %p40_p1 }
  0x31   : > { %2717 = dma.hbm_to_vmem [thread:$0]  (!%p3349_p11), %s3702_s3, 12288, %s280_s22, [#allocation6], %s3231_s24, %s3231_s24, %s3232_s25  }
  0x32   : > { %s3704_s21 = scalar_select %p3382_p3, 1, 0 }
  0x33   : > { %s3388_s23 = scalar_select %p31_p2, %s3223_s11, %s33_s19  }
  0x34   : > { %s2447_s27 = sshll.u32 %s308_s26, 5  ;;  %s2680_s22 = sshll.u32 %s3227_s12, 9 }
  0x35   : > { %3705 = sst [smem:[#allocation12_spill]] %s3388_s23  ;;  %s3395_s28 = scalar_lea.hbm %s3681_s0, %s2680_s22 }
  0x36   : > { %s312_s29 = scalar_lea.vmem [#allocation2], %s2447_s27  ;;  %p3399_p11 = pnand %p2728_p7, %p42_p9 }
  0x37   : > { %s319_s14 = sshll.u32 %s312_s29, 4  ;;  %s3403_s19 = scalar_lea.sflag [#allocation3], %s308_s26  ;;  %s3397_s14 = int_to_ptr.vmem [resolvable:$true] %s319_s14 }
  0x38   : > { %s3131_s1 = scalar_lea.hbm %s3395_s28, 512  ;;  %p3133_p0 = pneg %p3399_p11 }
  0x39   : > { %p3132_p13 = scmp.ne.s32.totalorder %s3395_s28, %s3131_s1  ;;  %s3136_s27 = scalar_lea.hbm %s3681_s0, 1024 }
  0x3a   : > { %p3137_p1 = scmp.lt.s32.totalorder %s3395_s28, %s3681_s0  ;;  %p3138_p2 = scmp.lt.s32.totalorder %s3136_s27, %s3131_s1 }
  0x3b   : > { %p3134_p5 = pnand %p3133_p0, %p3132_p13 }
  0x3c   : > { %p3139_p6 = por %p3138_p2, %p3137_p1 }
  0x3d   : > { %p3135_p10 = pneg %p3134_p5 }
  0x3f   : > { %p3140_p12 = pnand %p3139_p6, %p3135_p10 }
  0x41   : > { %3143 = shalt.err (!%p3140_p12)
}
  0x42   : > { %s3144_s26 = scalar_lea.vmem %s3397_s14, 512  ;;  %s3233_s3 = smov [#allocation2]  }
  0x43   : > { %p3145_p7 = scmp.ne.s32.totalorder %s3397_s14, %s3144_s26  ;;  %s3149_s23 = sshll.u32 %s3233_s3, 4  ;;  %s3150_s23 = int_to_ptr.vmem [resolvable:$false] %s3149_s23 }
  0x44   : > { %s3151_s22 = scalar_lea.vmem %s3150_s23, 1024  ;;  %p3152_p5 = scmp.lt.s32.totalorder %s3397_s14, %s3150_s23 }
  0x45   : > { %p3147_p9 = pnand %p3145_p7, %p3133_p0  ;;  %p3153_p3 = scmp.lt.s32.totalorder %s3151_s22, %s3144_s26 }
  0x47   : > { %p3148_p13 = pneg %p3147_p9  ;;  %p3154_p4 = por %p3153_p3, %p3152_p5 }
  0x49   : > { %p3155_p8 = pnand %p3154_p4, %p3148_p13 }
  0x4b   : > { %3158 = shalt.err (!%p3155_p8)
}
  0x4c   : > { %s3234_s1 = smov 256   ;;  %s3235_s24 = smov 16  }
  0x4d   : > { %2721 = dma.hbm_to_vmem [thread:$0]  (!%p3399_p11), %s3395_s28, 512, %s3397_s14, %s3403_s19, %s3234_s1, %s3234_s1, %s3235_s24  }
  0x4e   : > { %p3707_p0 = scmp.ne.s32.totalorder %s3699_s17, 0 }
  0x4f   : > { %s3427_s3 = sand.u32 (!%p3707_p0), 1, %s3219_s10   ;;  %p3708_p4 = scmp.ne.s32.totalorder (!%p3707_p0), %s3697_s15, 0 }
  0x50   : > { %331 = sbr.rel (%p3707_p0) target bundleno = 1444 (0x5a4), region = 56  ;;  %s2451_s23 = sshll.u32 (!%p3707_p0), %s3427_s3, 5 }
  0x51   : > { %s334_s27 = scalar_lea.sflag (!%p3707_p0), [#allocation3], %s3427_s3  ;;  %s3433_s25 = scalar_lea.vmem (!%p3707_p0), [#allocation2], %s2451_s23 }
  0x55   : > { %3202 = dma.done.wait (%p3708_p4), %s334_s27, 512  }
  0x56   : > { %3204 = vsyncadd (%p3708_p4), %s334_s27, 4294966784  ;;  %p3709_p8 = scmp.eq.s32.totalorder %s3321_s13, 0 }
  0x58   : > { %3206 = dma.done.wait (%p3709_p8), [#allocation6], 24576   ;;  %p3710_p3 = pmov %p3709_p8 }
  0x59   : > { %v2783_v0 = vld [vmem:[#allocation5 + $0x74] ss:$8 sps:$4 sm:$0xff]   ;;  %v2785_v1 = vld [vmem:[#allocation5 + $0x70] ss:$8 sps:$4 sm:$0xff]   ;;  %v2789_v4 = vld [vmem:[#allocation5 + $0x64] ss:$8 sps:$4 sm:$0xff]   ;;  %v380_v30 = vlaneseq }
  0x5a   : > { %3208 = vsyncadd (%p3710_p3), [#allocation6], 4294942720  ;;  %638 = vmatprep.subr.bf16.mxu0 %v2783_v0  ;;  %v2786_v2 = vld [vmem:[#allocation5 + $0x174] ss:$8 sps:$4 sm:$0xff]   ;;  %v2788_v3 = vld [vmem:[#allocation5 + $0x170] ss:$8 sps:$4 sm:$0xff]  }
  0x5b   : > { %639 = vmatpush1.bf16.msra.mxu0 %v2785_v1  ;;  %v2791_v5 = vld [vmem:[#allocation5 + $0x60] ss:$8 sps:$4 sm:$0xff]   ;;  %880 = vmatprep.subr.bf16.mxu1 %v2786_v2  ;;  %v2792_v6 = vld [vmem:[#allocation5 + $0x164] ss:$8 sps:$4 sm:$0xff]   ;;  %v2795_v8 = vld [vmem:[#allocation5 + $0x54] ss:$8 sps:$4 sm:$0xff]  }
  0x5c   : > { %881 = vmatpush1.bf16.msra.mxu1 %v2788_v3  ;;  %640 = vmatprep.subr.bf16.mxu0 %v2789_v4  ;;  %v2794_v7 = vld [vmem:[#allocation5 + $0x160] ss:$8 sps:$4 sm:$0xff]   ;;  %v2797_v9 = vld [vmem:[#allocation5 + $0x50] ss:$8 sps:$4 sm:$0xff]   ;;  %v2798_v10 = vld [vmem:[#allocation5 + $0x154] ss:$8 sps:$4 sm:$0xff]  }
  0x5d   : > { %882 = vmatprep.subr.bf16.mxu1 %v2792_v6  ;;  %v2801_v11 = vld [vmem:[#allocation5 + $0x44] ss:$8 sps:$4 sm:$0xff]   ;;  %v2800_v12 = vld [vmem:[#allocation5 + $0x150] ss:$8 sps:$4 sm:$0xff]   ;;  %v2803_v14 = vld [vmem:[#allocation5 + $0x40] ss:$8 sps:$4 sm:$0xff]  }
  0x5e   : > { %v2804_v13 = vld [vmem:[#allocation5 + $0x144] ss:$8 sps:$4 sm:$0xff]   ;;  %v2807_v15 = vld [vmem:[#allocation5 + $0x34] ss:$8 sps:$4 sm:$0xff]   ;;  %v2806_v16 = vld [vmem:[#allocation5 + $0x140] ss:$8 sps:$4 sm:$0xff]  }
  0x5f   : > { %641 = vmatpush1.bf16.msra.mxu0 %v2791_v5  ;;  %v2810_v17 = vld [vmem:[#allocation5 + $0x134] ss:$8 sps:$4 sm:$0xff]   ;;  %v2809_v18 = vld [vmem:[#allocation5 + $0x30] ss:$8 sps:$4 sm:$0xff]   ;;  %v2813_v19 = vld [vmem:[#allocation5 + $0x24] ss:$8 sps:$4 sm:$0xff]  }
  0x60   : > { %642 = vmatprep.subr.bf16.mxu0 %v2795_v8  ;;  %883 = vmatpush1.bf16.msra.mxu1 %v2794_v7  ;;  %v2812_v20 = vld [vmem:[#allocation5 + $0x130] ss:$8 sps:$4 sm:$0xff]   ;;  %v2816_v21 = vld [vmem:[#allocation5 + $0x124] ss:$8 sps:$4 sm:$0xff]   ;;  %v2815_v22 = vld [vmem:[#allocation5 + $0x20] ss:$8 sps:$4 sm:$0xff]  }
  0x61   : > { %884 = vmatprep.subr.bf16.mxu1 %v2798_v10  ;;  %v2819_v23 = vld [vmem:[#allocation5 + $0x14] ss:$8 sps:$4 sm:$0xff]   ;;  %v2818_v24 = vld [vmem:[#allocation5 + $0x120] ss:$8 sps:$4 sm:$0xff]   ;;  %v2821_v26 = vld [vmem:[#allocation5 + $0x10] ss:$8 sps:$4 sm:$0xff]  }
  0x62   : > { %v2822_v25 = vld [vmem:[#allocation5 + $0x114] ss:$8 sps:$4 sm:$0xff]   ;;  %v2825_v27 = vld [vmem:[#allocation5 + $0x4] ss:$8 sps:$4 sm:$0xff]   ;;  %v2824_v28 = vld [vmem:[#allocation5 + $0x110] ss:$8 sps:$4 sm:$0xff]  }
  0x63   : > { %643 = vmatpush1.bf16.msra.mxu0 %v2797_v9  ;;  %v2828_v29 = vld [vmem:[#allocation5 + $0x104] ss:$8 sps:$4 sm:$0xff]   ;;  %v2827_v31 = vld [vmem:[#allocation5] ss:$8 sps:$4 sm:$0xff]   ;;  %v2831_v32 = vld [vmem:[#allocation5 + $0xf4] ss:$8 sps:$4 sm:$0xff]  }
  0x64   : > { %644 = vmatprep.subr.bf16.mxu0 %v2801_v11  ;;  %885 = vmatpush1.bf16.msra.mxu1 %v2800_v12  ;;  %v2830_v33 = vld [vmem:[#allocation5 + $0x100] ss:$8 sps:$4 sm:$0xff]   ;;  %v2834_v34 = vld [vmem:[#allocation5 + $0x1f4] ss:$8 sps:$4 sm:$0xff]   ;;  %v3443_v35 = vshrl.u32 %v380_v30, 7  ;;  %vm3236_vm2 = vmmov 1  }
  0x65   : > { %886 = vmatprep.subr.bf16.mxu1 %v2804_v13  ;;  %v2833_v36 = vld [vmem:[#allocation5 + $0xf0] ss:$8 sps:$4 sm:$0xff]   ;;  %v2837_v37 = vld [vmem:[#allocation5 + $0xe4] ss:$8 sps:$4 sm:$0xff]   ;;  %v2839_v41 = vld [vmem:[#allocation5 + $0xe0] ss:$8 sps:$4 sm:$0xff]  }
  0x66   : > { %v2836_v38 = vld [vmem:[#allocation5 + $0x1f0] ss:$8 sps:$4 sm:$0xff]   ;;  %v2840_v39 = vld [vmem:[#allocation5 + $0x1e4] ss:$8 sps:$4 sm:$0xff]   ;;  %v387_v40 = vand.u32 15, %v3443_v35  ;;  %vm427_vm0 = vcmp.lt.s32.totalorder %v3443_v35, 1 }
  0x67   : > { %645 = vmatpush1.bf16.msra.mxu0 %v2803_v14  ;;  %v2843_v42 = vld [vmem:[#allocation5 + $0xd4] ss:$8 sps:$4 sm:$0xff]   ;;  %v2842_v43 = vld [vmem:[#allocation5 + $0x1e0] ss:$8 sps:$4 sm:$0xff]   ;;  %v2845_v46 = vld [vmem:[#allocation5 + $0xd0] ss:$8 sps:$4 sm:$0xff]  }
  0x68   : > { %646 = vmatprep.subr.bf16.mxu0 %v2807_v15  ;;  %887 = vmatpush1.bf16.msra.mxu1 %v2806_v16  ;;  %v2846_v44 = vld [vmem:[#allocation5 + $0x1d4] ss:$8 sps:$4 sm:$0xff]   ;;  %v432_v45 = vadd.s32 4294967295, %v387_v40  ;;  %v2849_v47 = vld [vmem:[#allocation5 + $0xc4] ss:$8 sps:$4 sm:$0xff]   ;;  %v382_v5 = vadd.s32 8, %v3443_v35 }
  0x69   : > { %888 = vmatprep.subr.bf16.mxu1 %v2810_v17  ;;  %v2848_v48 = vld [vmem:[#allocation5 + $0x1d0] ss:$8 sps:$4 sm:$0xff]   ;;  %v2852_v49 = vld [vmem:[#allocation5 + $0x1c4] ss:$8 sps:$4 sm:$0xff]   ;;  %v2851_v52 = vld [vmem:[#allocation5 + $0xc0] ss:$8 sps:$4 sm:$0xff]  }
  0x6a   : > { %v3447_v50 = vld [vmem:[%s3433_s25 + $0x8] sm:$0xff]  ;;  %v3450_v51 = vld [vmem:[%s3433_s25 + $0x18] sm:$0xff]  ;;  %vm434_vm1 = vcmp.ge.s32.totalorder %v432_v45, 0  ;;  %v3470_v6 = vld [vmem:[%s3433_s25] sm:$0xff]  ;;  %v394_v10 = vand.u32 15, %v382_v5  ;;  %vm931_vm4 = vcmp.lt.s32.totalorder %v3443_v35, 7 }
  0x6b   : > { %647 = vmatpush1.bf16.msra.mxu0 %v2809_v18  ;;  %v424_v53 = vrot.slane %v3447_v50, 7  ;;  %v426_v54 = vrot.slane %v3450_v51, 7  ;;  %v686_v55 = vpack.c.bf16 %v3450_v51, %v3447_v50  ;;  %v2855_v56 = vld [vmem:[#allocation5 + $0xb4] ss:$8 sps:$4 sm:$0xff]   ;;  %v2854_v57 = vld [vmem:[#allocation5 + $0x1c0] ss:$8 sps:$4 sm:$0xff]   ;;  %vm3462_vm3 = vmpackc.low %vm3236_vm2, %vm434_vm1 }
  0x6c   : > { %648 = vmatprep.subr.bf16.mxu0 %v2813_v19  ;;  %889 = vmatpush1.bf16.msra.mxu1 %v2812_v20  ;;  %v2858_v61 = vld [vmem:[#allocation5 + $0x1b4] ss:$8 sps:$4 sm:$0xff]   ;;  %v2857_v63 = vld [vmem:[#allocation5 + $0xb0] ss:$8 sps:$4 sm:$0xff]   ;;  %v2861_v0 = vld [vmem:[#allocation5 + $0xa4] ss:$8 sps:$4 sm:$0xff]  }
  0x6d   : > { %890 = vmatprep.subr.bf16.mxu1 %v2816_v21  ;;  %v429_v58 = vsel %vm427_vm0, %v424_v53, %v426_v54  ;;  %v431_v59 = vsel %vm427_vm0, %v426_v54, %v424_v53  ;;  %912 = vmatprep.mubr.bf16.mxu1 %v686_v55  ;;  %v2860_v1 = vld [vmem:[#allocation5 + $0x1b0] ss:$8 sps:$4 sm:$0xff]   ;;  %v2863_v2 = vld [vmem:[#allocation5 + $0xa0] ss:$8 sps:$4 sm:$0xff]   ;;  %v2864_v3 = vld [vmem:[#allocation5 + $0x1a4] ss:$8 sps:$4 sm:$0xff]  }
  0x6e   : > { %v2488_v62 = vpack.c.bf16 %v429_v58, %v431_v59  ;;  %v2867_v4 = vld [vmem:[#allocation5 + $0x94] ss:$8 sps:$4 sm:$0xff]   ;;  %v2866_v8 = vld [vmem:[#allocation5 + $0x1a0] ss:$8 sps:$4 sm:$0xff]   ;;  %v2869_v11 = vld [vmem:[#allocation5 + $0x90] ss:$8 sps:$4 sm:$0xff]  }
  0x6f   : > { %649 = vmatpush1.bf16.msra.mxu0 %v2815_v22  ;;  %v3473_v7 = vld [vmem:[%s3433_s25 + $0x10] sm:$0xff]  ;;  %v423_v12 = vrot.slane %v3470_v6, 7  ;;  %v2873_v14 = vld [vmem:[#allocation5 + $0x84] ss:$8 sps:$4 sm:$0xff]   ;;  %v928_v15 = vrot.slane %v3447_v50, 1  ;;  %v930_v16 = vrot.slane %v3450_v51, 1 }
  0x70   : > { %650 = vmatprep.subr.bf16.mxu0 %v2819_v23  ;;  %891 = vmatpush1.bf16.msra.mxu1 %v2818_v24  ;;  %v2870_v9 = vld [vmem:[#allocation5 + $0x194] ss:$8 sps:$4 sm:$0xff]   ;;  %v425_v13 = vrot.slane %v3473_v7, 7  ;;  %v2872_v17 = vld [vmem:[#allocation5 + $0x190] ss:$8 sps:$4 sm:$0xff]   ;;  %v937_v19 = vadd.s32 1, %v394_v10  ;;  %v685_v30 = vpack.c.bf16 %v3473_v7, %v3470_v6 }
  0x71   : > { %892 = vmatprep.subr.bf16.mxu1 %v2822_v25  ;;  %2489 = vmatprep.mubr.msk.bf16.mxu0 %vm3462_vm3, %v2488_v62  ;;  %v2876_v18 = vld [vmem:[#allocation5 + $0x184] ss:$8 sps:$4 sm:$0xff]   ;;  %v2875_v20 = vld [vmem:[#allocation5 + $0x80] ss:$8 sps:$4 sm:$0xff]   ;;  %v2881_v23 = vld [vmem:[#allocation5 + $0x274] ss:$8 sps:$4 sm:$0xff]   ;;  %v933_v24 = vsel %vm931_vm4, %v928_v15, %v930_v16  ;;  %v935_v25 = vsel %vm931_vm4, %v930_v16, %v928_v15 }
  0x72   : > { %v428_v21 = vsel %vm427_vm0, %v423_v12, %v425_v13  ;;  %v430_v22 = vsel %vm427_vm0, %v425_v13, %v423_v12  ;;  %vm941_vm5 = vcmp.lt.s32.totalorder %v937_v19, 16  ;;  %v2891_v40 = vld [vmem:[#allocation5 + $0x230] ss:$8 sps:$4 sm:$0xff]   ;;  %v2902_v45 = vld [vmem:[#allocation5 + $0x204] ss:$8 sps:$4 sm:$0xff]   ;;  %v927_v62 = vrot.slane %v3470_v6, 1 }
  0x73   : > { %651 = vmatpush1.bf16.msra.mxu0 %v2821_v26  ;;  %v2878_v26 = vld [vmem:[#allocation5 + $0x180] ss:$8 sps:$4 sm:$0xff]   ;;  %vm3491_vm6 = vmpackc.low %vm941_vm5, %vm3236_vm2  ;;  %v2911_v51 = vld [vmem:[#allocation5 + $0x2d4] ss:$8 sps:$4 sm:$0xff]   ;;  %s3237_s20 = smov 80   ;;  %s3238_s19 = smov 112  }
  0x74   : > { %652 = vmatprep.subr.bf16.mxu0 %v2825_v27  ;;  %893 = vmatpush1.bf16.msra.mxu1 %v2824_v28  ;;  %v2491_v27 = vpack.c.bf16 %v428_v21, %v430_v22  ;;  %v2879_v28 = vld [vmem:[#allocation5 + $0x270] ss:$8 sps:$4 sm:$0xff]   ;;  %v2906_v50 = vld [vmem:[#allocation5 + $0x2e0] ss:$8 sps:$4 sm:$0xff]   ;;  %v2914_v53 = vld [vmem:[#allocation5 + $0x2c4] ss:$8 sps:$4 sm:$0xff]  }
  0x75   : > { %894 = vmatprep.subr.bf16.mxu1 %v2828_v29  ;;  %v2558_v29 = vpack.c.bf16 %v935_v25, %v933_v24  ;;  %v2912_v54 = vld [vmem:[#allocation5 + $0x2c0] ss:$8 sps:$4 sm:$0xff]   ;;  %v2917_v55 = vld [vmem:[#allocation5 + $0x2b4] ss:$8 sps:$4 sm:$0xff]   ;;  %v2927_v5 = vld [vmem:[#allocation7 + $0x170] ss:$8 sps:$4 sm:$0xff]  }
  0x76   : > { %v2918_v58 = vld [vmem:[#allocation5 + $0x2a0] ss:$8 sps:$4 sm:$0xff]   ;;  %v2923_v59 = vld [vmem:[#allocation5 + $0x294] ss:$8 sps:$4 sm:$0xff]   ;;  %v2938_v10 = vld [vmem:[#allocation7 + $0x64] ss:$8 sps:$4 sm:$0xff]  }
  0x77   : > { %653 = vmatpush1.bf16.msra.mxu0 %v2827_v31  ;;  %v2884_v31 = vld [vmem:[#allocation5 + $0x264] ss:$8 sps:$4 sm:$0xff]   ;;  %v2929_v6 = vld [vmem:[#allocation7 + $0x174] ss:$8 sps:$4 sm:$0xff]   ;;  %v2936_v12 = vld [vmem:[#allocation7 + $0x60] ss:$8 sps:$4 sm:$0xff]  }
  0x78   : > { %654 = vmatprep.subr.bf16.mxu0 %v2831_v32  ;;  %895 = vmatpush1.bf16.msra.mxu1 %v2830_v33  ;;  %v2882_v32 = vld [vmem:[#allocation5 + $0x260] ss:$8 sps:$4 sm:$0xff]   ;;  %v2941_v13 = vld [vmem:[#allocation7 + $0x154] ss:$8 sps:$4 sm:$0xff]   ;;  %v2939_v15 = vld [vmem:[#allocation7 + $0x150] ss:$8 sps:$4 sm:$0xff]  }
  0x79   : > { %896 = vmatprep.subr.bf16.mxu1 %v2834_v34  ;;  %v2887_v34 = vld [vmem:[#allocation5 + $0x254] ss:$8 sps:$4 sm:$0xff]   ;;  %v2942_v16 = vld [vmem:[#allocation7 + $0x50] ss:$8 sps:$4 sm:$0xff]   ;;  %v2945_v19 = vld [vmem:[#allocation7 + $0x140] ss:$8 sps:$4 sm:$0xff]  }
  0x7a   : > { %v2953_v21 = vld [vmem:[#allocation7 + $0x134] ss:$8 sps:$4 sm:$0xff]   ;;  %v2954_v24 = vld [vmem:[#allocation7 + $0x30] ss:$8 sps:$4 sm:$0xff]   ;;  %v2959_v25 = vld [vmem:[#allocation7 + $0x124] ss:$8 sps:$4 sm:$0xff]  }
  0x7b   : > { %655 = vmatpush2.bf16.msra.mxu0 %v2833_v36  ;;  %v2885_v36 = vld [vmem:[#allocation5 + $0x250] ss:$8 sps:$4 sm:$0xff]   ;;  %v2956_v22 = vld [vmem:[#allocation7 + $0x34] ss:$8 sps:$4 sm:$0xff]   ;;  %v3040_v60 = vld [vmem:[#allocation7 + $0x224] ss:$8 sps:$4 sm:$0xff]  }
  0x7c   : > { %656 = vmatprep.subr.bf16.mxu0 %v2837_v37  ;;  %897 = vmatpush2.bf16.msra.mxu1 %v2836_v38  ;;  %v2890_v37 = vld [vmem:[#allocation5 + $0x244] ss:$8 sps:$4 sm:$0xff]   ;;  %v2888_v38 = vld [vmem:[#allocation5 + $0x240] ss:$8 sps:$4 sm:$0xff]   ;;  %s3239_s29 = smov 64   ;;  %s3240_s26 = smov 96  }
  0x7d   : > { %898 = vmatprep.subr.bf16.mxu1 %v2840_v39  ;;  %v2893_v39 = vld [vmem:[#allocation5 + $0x234] ss:$8 sps:$4 sm:$0xff]   ;;  %s3241_s22 = smov 32   ;;  %s3242_s1 = smov 48   ;;  %vm3245_vm7 = vmmov 0   ;;  %vm2205_vm8 = vcmask 1043456  }
  0x7e   : > { %s3243_s24 = smov 16   ;;  %vm2111_vm9 = vcmask 130048   ;;  %vm2201_vm10 = vcmask 31744   ;;  %vm2308_vm11 = vcmask 261120   ;;  %vm2310_vm12 = vcmask 392192   ;;  %p3715_p10 = scmp.ne.s32.totalorder %s3704_s21, 0 }
  0x7f   : > { %657 = vmatpush2.bf16.msra.mxu0 %v2839_v41  ;;  %v2896_v41 = vld [vmem:[#allocation5 + $0x224] ss:$8 sps:$4 sm:$0xff]   ;;  %vm2312_vm13 = vcmask 523264   ;;  %vm2314_vm14 = vcmask 654336   ;;  %vm2316_vm15 = vcmask 785408   ;;  %s3248_s27 = smov [#allocation8]  }
  0x80   : > { %658 = vmatprep.subr.bf16.mxu0 %v2843_v42  ;;  %899 = vmatpush2.bf16.msra.mxu1 %v2842_v43  ;;  %v2894_v42 = vld [vmem:[#allocation5 + $0x220] ss:$8 sps:$4 sm:$0xff]   ;;  %v2899_v43 = vld [vmem:[#allocation5 + $0x214] ss:$8 sps:$4 sm:$0xff]   ;;  %s3163_s15 = sshll.u32 %s3248_s27, 4  ;;  %s3164_s15 = int_to_ptr.vmem [resolvable:$false] %s3163_s15 }
  0x81   : > { %900 = vmatprep.subr.bf16.mxu1 %v2846_v44  ;;  %v2897_v44 = vld [vmem:[#allocation5 + $0x210] ss:$8 sps:$4 sm:$0xff]  }
  0x83   : > { %659 = vmatpush2.bf16.msra.mxu0 %v2845_v46  ;;  %v2900_v46 = vld [vmem:[#allocation5 + $0x200] ss:$8 sps:$4 sm:$0xff]  }
  0x84   : > { %660 = vmatprep.subr.bf16.mxu0 %v2849_v47  ;;  %901 = vmatpush2.bf16.msra.mxu1 %v2848_v48  ;;  %v2905_v47 = vld [vmem:[#allocation5 + $0x2f4] ss:$8 sps:$4 sm:$0xff]   ;;  %v2903_v48 = vld [vmem:[#allocation5 + $0x2f0] ss:$8 sps:$4 sm:$0xff]  }
  0x85   : > { %902 = vmatprep.subr.bf16.mxu1 %v2852_v49  ;;  %v2908_v49 = vld [vmem:[#allocation5 + $0x2e4] ss:$8 sps:$4 sm:$0xff]  }
  0x87   : > { %661 = vmatpush2.bf16.msra.mxu0 %v2851_v52  ;;  %v2909_v52 = vld [vmem:[#allocation5 + $0x2d0] ss:$8 sps:$4 sm:$0xff]  }
  0x88   : > { %662 = vmatprep.subr.bf16.mxu0 %v2855_v56  ;;  %903 = vmatpush2.bf16.msra.mxu1 %v2854_v57  ;;  %v2915_v56 = vld [vmem:[#allocation5 + $0x2b0] ss:$8 sps:$4 sm:$0xff]   ;;  %v2920_v57 = vld [vmem:[#allocation5 + $0x2a4] ss:$8 sps:$4 sm:$0xff]  }
  0x89   : > { %904 = vmatprep.subr.bf16.mxu1 %v2858_v61  ;;  %v2921_v61 = vld [vmem:[#allocation5 + $0x290] ss:$8 sps:$4 sm:$0xff]  }
  0x8b   : > { %663 = vmatpush2.bf16.msra.mxu0 %v2857_v63  ;;  %v929_v63 = vrot.slane %v3473_v7, 1  ;;  %v2932_v7 = vld [vmem:[#allocation7 + $0x74] ss:$8 sps:$4 sm:$0xff]  }
  0x8c   : > { %664 = vmatprep.subr.bf16.mxu0 %v2861_v0  ;;  %905 = vmatpush2.bf16.msra.mxu1 %v2860_v1  ;;  %v2926_v0 = vld [vmem:[#allocation5 + $0x284] ss:$8 sps:$4 sm:$0xff]   ;;  %v2924_v1 = vld [vmem:[#allocation5 + $0x280] ss:$8 sps:$4 sm:$0xff]  }
  0x8d   : > { %906 = vmatprep.subr.bf16.mxu1 %v2864_v3  ;;  %v934_v3 = vsel %vm931_vm4, %v929_v63, %v927_v62 }
  0x8f   : > { %665 = vmatpush2.bf16.msra.mxu0 %v2863_v2  ;;  %v932_v2 = vsel %vm931_vm4, %v927_v62, %v929_v63  ;;  %v3010_v62 = vld [vmem:[#allocation7 + $0xa4] ss:$8 sps:$4 sm:$0xff]   ;;  %v3008_v63 = vld [vmem:[#allocation7 + $0xa0] ss:$8 sps:$4 sm:$0xff]  }
  0x90   : > { %666 = vmatprep.subr.bf16.mxu0 %v2867_v4  ;;  %907 = vmatpush2.bf16.msra.mxu1 %v2866_v8  ;;  %v2561_v4 = vpack.c.bf16 %v934_v3, %v932_v2  ;;  %v2930_v8 = vld [vmem:[#allocation7 + $0x70] ss:$8 sps:$4 sm:$0xff]   ;;  %v3016_v2 = vld [vmem:[#allocation7 + $0x94] ss:$8 sps:$4 sm:$0xff]  }
  0x91   : > { %908 = vmatprep.subr.bf16.mxu1 %v2870_v9  ;;  %v2935_v9 = vld [vmem:[#allocation7 + $0x164] ss:$8 sps:$4 sm:$0xff]   ;;  %v3014_v3 = vld [vmem:[#allocation7 + $0x90] ss:$8 sps:$4 sm:$0xff]  }
  0x93   : > { %667 = vmatpush2.bf16.msra.mxu0 %v2869_v11  ;;  %v2933_v11 = vld [vmem:[#allocation7 + $0x160] ss:$8 sps:$4 sm:$0xff]  }
  0x94   : > { %668 = vmatprep.subr.bf16.mxu0 %v2873_v14  ;;  %909 = vmatpush2.bf16.msra.mxu1 %v2872_v17  ;;  %v2944_v14 = vld [vmem:[#allocation7 + $0x54] ss:$8 sps:$4 sm:$0xff]   ;;  %v2947_v17 = vld [vmem:[#allocation7 + $0x144] ss:$8 sps:$4 sm:$0xff]  }
  0x95   : > { %910 = vmatprep.subr.bf16.mxu1 %v2876_v18  ;;  %v2950_v18 = vld [vmem:[#allocation7 + $0x44] ss:$8 sps:$4 sm:$0xff]  }
  0x97   : > { %669 = vmatpush2.bf16.msra.mxu0 %v2875_v20  ;;  %v2948_v20 = vld [vmem:[#allocation7 + $0x40] ss:$8 sps:$4 sm:$0xff]  }
  0x98   : > { %1143 = vmatprep.subr.bf16.mxu0 %v2881_v23  ;;  %911 = vmatpush2.bf16.msra.mxu1 %v2878_v26  ;;  %v2951_v23 = vld [vmem:[#allocation7 + $0x130] ss:$8 sps:$4 sm:$0xff]   ;;  %v2962_v26 = vld [vmem:[#allocation7 + $0x24] ss:$8 sps:$4 sm:$0xff]  }
  0x99   : > { %1412 = vmatprep.subr.bf16.mxu1 %v2932_v7  ;;  %v3025_v7 = vld [vmem:[#allocation7 + $0x274] ss:$8 sps:$4 sm:$0xff]  }
  0x9a   : > { %2492 = vmatmul.mubr.msk.bf16.vlgmr.msra.gmra.mxu0 %vm3462_vm3, %v2491_v27  ;;  %v2957_v27 = vld [vmem:[#allocation7 + $0x120] ss:$8 sps:$4 sm:$0xff]  }
  0x9b   : > { %1144 = vmatpush1.bf16.msra.mxu0 %v2879_v28  ;;  %2559 = vmatprep.mubr.msk.bf16.mxu0 %vm3491_vm6, %v2558_v29  ;;  %v2960_v28 = vld [vmem:[#allocation7 + $0x20] ss:$8 sps:$4 sm:$0xff]   ;;  %v2965_v29 = vld [vmem:[#allocation7 + $0x114] ss:$8 sps:$4 sm:$0xff]  }
  0x9c   : > { %913 = vmatmul.mubr.bf16.vlgmr.msra.gmra.mxu1 %v685_v30  ;;  %1145 = vmatprep.subr.bf16.mxu0 %v2884_v31  ;;  %v2968_v30 = vld [vmem:[#allocation7 + $0x14] ss:$8 sps:$4 sm:$0xff]   ;;  %v2963_v31 = vld [vmem:[#allocation7 + $0x110] ss:$8 sps:$4 sm:$0xff]  }
  0x9d   : > { %1413 = vmatpush1.bf16.msra.mxu1 %v2930_v8  ;;  %v3020_v8 = vld [vmem:[#allocation7 + $0x80] ss:$8 sps:$4 sm:$0xff]  }
  0x9e   : > { %1414 = vmatprep.subr.bf16.mxu1 %v2938_v10  ;;  %v3508_v10 = vsub.s32 0, %v3443_v35 }
  0x9f   : > { %1146 = vmatpush1.bf16.msra.mxu0 %v2882_v32  ;;  %v2966_v32 = vld [vmem:[#allocation7 + $0x10] ss:$8 sps:$4 sm:$0xff]  }
  0xa0   : > { %1147 = vmatprep.subr.bf16.mxu0 %v2887_v34  ;;  %v2971_v34 = vld [vmem:[#allocation7 + $0x104] ss:$8 sps:$4 sm:$0xff]  }
  0xa1   : > { %1415 = vmatpush1.bf16.msra.mxu1 %v2936_v12  ;;  %v419_v12 = vsub.s32 1, %v3443_v35 }
  0xa2   : > { %1416 = vmatprep.subr.bf16.mxu1 %v2944_v14 }
  0xa3   : > { %1148 = vmatpush1.bf16.msra.mxu0 %v2885_v36  ;;  %v2974_v36 = vld [vmem:[#allocation7 + $0x4] ss:$8 sps:$4 sm:$0xff]  }
  0xa4   : > { %1149 = vmatprep.subr.bf16.mxu0 %v2890_v37  ;;  %v2969_v37 = vld [vmem:[#allocation7 + $0x100] ss:$8 sps:$4 sm:$0xff]  }
  0xa5   : > { %1417 = vmatpush1.bf16.msra.mxu1 %v2942_v16 }
  0xa6   : > { %1418 = vmatprep.subr.bf16.mxu1 %v2950_v18 }
  0xa7   : > { %1150 = vmatpush1.bf16.msra.mxu0 %v2888_v38  ;;  %v2972_v38 = vld [vmem:[#allocation7] ss:$8 sps:$4 sm:$0xff]  }
  0xa8   : > { %1151 = vmatprep.subr.bf16.mxu0 %v2893_v39  ;;  %v2977_v39 = vld [vmem:[#allocation7 + $0x1f4] ss:$8 sps:$4 sm:$0xff]  }
  0xa9   : > { %1419 = vmatpush1.bf16.msra.mxu1 %v2948_v20 }
  0xaa   : > { %1420 = vmatprep.subr.bf16.mxu1 %v2956_v22 }
  0xab   : > { %1152 = vmatpush1.bf16.msra.mxu0 %v2891_v40  ;;  %v2980_v40 = vld [vmem:[#allocation7 + $0xf4] ss:$8 sps:$4 sm:$0xff]  }
  0xac   : > { %1153 = vmatprep.subr.bf16.mxu0 %v2896_v41  ;;  %v2975_v41 = vld [vmem:[#allocation7 + $0x1f0] ss:$8 sps:$4 sm:$0xff]  }
  0xad   : > { %1421 = vmatpush1.bf16.msra.mxu1 %v2954_v24 }
  0xae   : > { %1422 = vmatprep.subr.bf16.mxu1 %v2962_v26 }
  0xaf   : > { %1154 = vmatpush1.bf16.msra.mxu0 %v2894_v42  ;;  %v2978_v42 = vld [vmem:[#allocation7 + $0xf0] ss:$8 sps:$4 sm:$0xff]  }
  0xb0   : > { %1155 = vmatprep.subr.bf16.mxu0 %v2899_v43  ;;  %v2983_v43 = vld [vmem:[#allocation7 + $0x1e4] ss:$8 sps:$4 sm:$0xff]  }
  0xb1   : > { %1423 = vmatpush1.bf16.msra.mxu1 %v2960_v28 }
  0xb2   : > { %1424 = vmatprep.subr.bf16.mxu1 %v2968_v30 }
  0xb3   : > { %1156 = vmatpush1.bf16.msra.mxu0 %v2897_v44  ;;  %v2986_v44 = vld [vmem:[#allocation7 + $0xe4] ss:$8 sps:$4 sm:$0xff]  }
  0xb4   : > { %1157 = vmatprep.subr.bf16.mxu0 %v2902_v45  ;;  %v2981_v45 = vld [vmem:[#allocation7 + $0x1e0] ss:$8 sps:$4 sm:$0xff]  }
  0xb5   : > { %1425 = vmatpush1.bf16.msra.mxu1 %v2966_v32 }
  0xb6   : > { %1426 = vmatprep.subr.bf16.mxu1 %v2974_v36 }
  0xb7   : > { %1158 = vmatpush1.bf16.msra.mxu0 %v2900_v46  ;;  %v2984_v46 = vld [vmem:[#allocation7 + $0xe0] ss:$8 sps:$4 sm:$0xff]  }
  0xb8   : > { %1159 = vmatprep.subr.bf16.mxu0 %v2905_v47  ;;  %v2989_v47 = vld [vmem:[#allocation7 + $0x1d4] ss:$8 sps:$4 sm:$0xff]  }
  0xb9   : > { %1427 = vmatpush1.bf16.msra.mxu1 %v2972_v38 }
  0xba   : > { %1428 = vmatprep.subr.bf16.mxu1 %v2980_v40 }
  0xbb   : > { %1160 = vmatpush2.bf16.msra.mxu0 %v2903_v48  ;;  %v2992_v48 = vld [vmem:[#allocation7 + $0xd4] ss:$8 sps:$4 sm:$0xff]  }
  0xbc   : > { %1161 = vmatprep.subr.bf16.mxu0 %v2908_v49  ;;  %v2987_v49 = vld [vmem:[#allocation7 + $0x1d0] ss:$8 sps:$4 sm:$0xff]  }
  0xbd   : > { %1429 = vmatpush2.bf16.msra.mxu1 %v2978_v42 }
  0xbe   : > { %1430 = vmatprep.subr.bf16.mxu1 %v2986_v44 }
  0xbf   : > { %1162 = vmatpush2.bf16.msra.mxu0 %v2906_v50  ;;  %v2990_v50 = vld [vmem:[#allocation7 + $0xd0] ss:$8 sps:$4 sm:$0xff]  }
  0xc0   : > { %1163 = vmatprep.subr.bf16.mxu0 %v2911_v51  ;;  %v2995_v51 = vld [vmem:[#allocation7 + $0x1c4] ss:$8 sps:$4 sm:$0xff]  }
  0xc1   : > { %1431 = vmatpush2.bf16.msra.mxu1 %v2984_v46 }
  0xc2   : > { %1432 = vmatprep.subr.bf16.mxu1 %v2992_v48 }
  0xc3   : > { %1164 = vmatpush2.bf16.msra.mxu0 %v2909_v52  ;;  %v2998_v52 = vld [vmem:[#allocation7 + $0xc4] ss:$8 sps:$4 sm:$0xff]  }
  0xc4   : > { %1165 = vmatprep.subr.bf16.mxu0 %v2914_v53  ;;  %v2993_v53 = vld [vmem:[#allocation7 + $0x1c0] ss:$8 sps:$4 sm:$0xff]  }
  0xc5   : > { %1433 = vmatpush2.bf16.msra.mxu1 %v2990_v50 }
  0xc6   : > { %1434 = vmatprep.subr.bf16.mxu1 %v2998_v52 }
  0xc7   : > { %1166 = vmatpush2.bf16.msra.mxu0 %v2912_v54  ;;  %v2996_v54 = vld [vmem:[#allocation7 + $0xc0] ss:$8 sps:$4 sm:$0xff]  }
  0xc8   : > { %1167 = vmatprep.subr.bf16.mxu0 %v2917_v55  ;;  %v3001_v55 = vld [vmem:[#allocation7 + $0x1b4] ss:$8 sps:$4 sm:$0xff]  }
  0xc9   : > { %1435 = vmatpush2.bf16.msra.mxu1 %v2996_v54 }
  0xcb   : > { %1168 = vmatpush2.bf16.msra.mxu0 %v2915_v56  ;;  %v2999_v56 = vld [vmem:[#allocation7 + $0x1b0] ss:$8 sps:$4 sm:$0xff]  }
  0xcc   : > { %1169 = vmatprep.subr.bf16.mxu0 %v2920_v57  ;;  %v3004_v57 = vld [vmem:[#allocation7 + $0xb4] ss:$8 sps:$4 sm:$0xff]  }
  0xcd   : > { %1436 = vmatprep.subr.bf16.mxu1 %v3004_v57 }
  0xcf   : > { %1170 = vmatpush2.bf16.msra.mxu0 %v2918_v58  ;;  %v3002_v58 = vld [vmem:[#allocation7 + $0xb0] ss:$8 sps:$4 sm:$0xff]  }
  0xd0   : > { %1171 = vmatprep.subr.bf16.mxu0 %v2923_v59  ;;  %v3007_v59 = vld [vmem:[#allocation7 + $0x1a4] ss:$8 sps:$4 sm:$0xff]   ;;  %1437 = vmatpush2.bf16.msra.mxu1 %v3002_v58 }
  0xd1   : > { %1438 = vmatprep.subr.bf16.mxu1 %v3010_v62 }
  0xd3   : > { %1172 = vmatpush2.bf16.msra.mxu0 %v2921_v61  ;;  %v3005_v61 = vld [vmem:[#allocation7 + $0x1a0] ss:$8 sps:$4 sm:$0xff]  }
  0xd4   : > { %1173 = vmatprep.subr.bf16.mxu0 %v2926_v0  ;;  %1439 = vmatpush2.bf16.msra.mxu1 %v3008_v63  ;;  %v3013_v0 = vld [vmem:[#allocation7 + $0x194] ss:$8 sps:$4 sm:$0xff]  }
  0xd5   : > { %1440 = vmatprep.subr.bf16.mxu1 %v3016_v2 }
  0xd7   : > { %1174 = vmatpush2.bf16.msra.mxu0 %v2924_v1  ;;  %v3011_v1 = vld [vmem:[#allocation7 + $0x190] ss:$8 sps:$4 sm:$0xff]  }
  0xd8   : > { %1654 = vmatprep.subr.bf16.mxu0 %v2929_v6  ;;  %1441 = vmatpush2.bf16.msra.mxu1 %v3014_v3  ;;  %v3022_v6 = vld [vmem:[#allocation7 + $0x84] ss:$8 sps:$4 sm:$0xff]  }
  0xd9   : > { %1442 = vmatprep.subr.bf16.mxu1 %v3022_v6  ;;  %v3028_v3 = vld [vmem:[#allocation7 + $0x264] ss:$8 sps:$4 sm:$0xff]   ;;  %v3031_v6 = vld [vmem:[#allocation7 + $0x254] ss:$8 sps:$4 sm:$0xff]  }
  0xda   : > { %2562 = vmatmul.mubr.msk.bf16.vlgmr.msra.gmra.mxu0 %vm3491_vm6, %v2561_v4  ;;  %v3019_v4 = vld [vmem:[#allocation7 + $0x184] ss:$8 sps:$4 sm:$0xff]  }
  0xdb   : > { %1655 = vmatpush1.bf16.msra.mxu0 %v2927_v5  ;;  %v3017_v5 = vld [vmem:[#allocation7 + $0x180] ss:$8 sps:$4 sm:$0xff]  }
  0xdc   : > { %1656 = vmatprep.subr.bf16.mxu0 %v2935_v9  ;;  %1443 = vmatpush2.bf16.msra.mxu1 %v3020_v8  ;;  %v3029_v8 = vld [vmem:[#allocation7 + $0x250] ss:$8 sps:$4 sm:$0xff]  }
  0xdd   : > { %1908 = vmatprep.subr.bf16.mxu1 %v3025_v7  ;;  %v3034_v7 = vld [vmem:[#allocation7 + $0x244] ss:$8 sps:$4 sm:$0xff]  }
  0xdf   : > { %1657 = vmatpush1.bf16.msra.mxu0 %v2933_v11  ;;  %v411_v11 = vld [vmem:[%s3683_s2] sm:$0x3] }
  0xe0   : > { %1658 = vmatprep.subr.bf16.mxu0 %v2941_v13  ;;  %v420_v16 = vrot.slane %v411_v11, %v419_v12 }
  0xe3   : > { %1659 = vmatpush1.bf16.msra.mxu0 %v2939_v15  ;;  %v416_v15 = vrot.slane %v411_v11, %v3508_v10  ;;  %v3037_v11 = vld [vmem:[#allocation7 + $0x234] ss:$8 sps:$4 sm:$0xff]  }
  0xe4   : > { %1660 = vmatprep.subr.bf16.mxu0 %v2947_v17 }
  0xe7   : > { %1661 = vmatpush1.bf16.msra.mxu0 %v2945_v19 }
  0xe8   : > { %1662 = vmatprep.subr.bf16.mxu0 %v2953_v21 }
  0xeb   : > { %1663 = vmatpush1.bf16.msra.mxu0 %v2951_v23 }
  0xec   : > { %1664 = vmatprep.subr.bf16.mxu0 %v2959_v25 }
  0xef   : > { %1665 = vmatpush1.bf16.msra.mxu0 %v2957_v27 }
  0xf0   : > { %1666 = vmatprep.subr.bf16.mxu0 %v2965_v29 }
  0xf3   : > { %1667 = vmatpush1.bf16.msra.mxu0 %v2963_v31 }
  0xf4   : > { %1668 = vmatprep.subr.bf16.mxu0 %v2971_v34 }
  0xf7   : > { %1669 = vmatpush1.bf16.msra.mxu0 %v2969_v37 }
  0xf8   : > { %1670 = vmatprep.subr.bf16.mxu0 %v2977_v39 }
  0xfb   : > { %1671 = vmatpush2.bf16.msra.mxu0 %v2975_v41 }
  0xfc   : > { %1672 = vmatprep.subr.bf16.mxu0 %v2983_v43 }
  0xff   : > { %1673 = vmatpush2.bf16.msra.mxu0 %v2981_v45 }
 0x100   : > { %1674 = vmatprep.subr.bf16.mxu0 %v2989_v47 }
 0x103   : > { %1675 = vmatpush2.bf16.msra.mxu0 %v2987_v49 }
 0x104   : > { %1676 = vmatprep.subr.bf16.mxu0 %v2995_v51 }
 0x107   : > { %1677 = vmatpush2.bf16.msra.mxu0 %v2993_v53 }
 0x108   : > { %1678 = vmatprep.subr.bf16.mxu0 %v3001_v55 }
 0x10b   : > { %1679 = vmatpush2.bf16.msra.mxu0 %v2999_v56 }
 0x10c   : > { %1680 = vmatprep.subr.bf16.mxu0 %v3007_v59 }
 0x10f   : > { %1681 = vmatpush2.bf16.msra.mxu0 %v3005_v61 }
 0x110   : > { %1682 = vmatprep.subr.bf16.mxu0 %v3013_v0 }
 0x113   : > { %1683 = vmatpush2.bf16.msra.mxu0 %v3011_v1  ;;  %v3023_v1 = vld [vmem:[#allocation7 + $0x270] ss:$8 sps:$4 sm:$0xff]  }
 0x114   : > { %1684 = vmatprep.subr.bf16.mxu0 %v3019_v4 }
 0x117   : > { %1685 = vmatpush2.bf16.msra.mxu0 %v3017_v5  ;;  %v3026_v5 = vld [vmem:[#allocation7 + $0x260] ss:$8 sps:$4 sm:$0xff]  }
 0x15a   : > { %v672_v9 = vpop.f32.mrf.mxu0 }
 0x15b   : > { %v681_v19 = vadd.f32 %v672_v9, %v416_v15  ;;  %v3032_v9 = vld [vmem:[#allocation7 + $0x240] ss:$8 sps:$4 sm:$0xff]  }
 0x15c   : > { %v674_v13 = vpop.f32.mrf.mxu0  ;;  %v914_v14 = vpop.f32.mrf.mxu1 }
 0x15d   : > { %v682_v20 = vadd.f32 %v674_v13, %v420_v16  ;;  %v923_v23 = vadd.f32 %v914_v14, %v681_v19  ;;  %v3035_v13 = vld [vmem:[#allocation7 + $0x230] ss:$8 sps:$4 sm:$0xff]   ;;  %v3038_v14 = vld [vmem:[#allocation7 + $0x220] ss:$8 sps:$4 sm:$0xff]   ;;  %v3049_v19 = vld [vmem:[#allocation7 + $0x2f4] ss:$8 sps:$4 sm:$0xff]  }
 0x15e   : > { %v676_v17 = vpop.f32.mrf.mxu0  ;;  %v916_v18 = vpop.f32.mrf.mxu1 }
 0x15f   : > { %v683_v24 = vadd.f32 %v676_v17, %v416_v15  ;;  %v924_v26 = vadd.f32 %v916_v18, %v682_v20  ;;  %v3043_v15 = vld [vmem:[#allocation7 + $0x214] ss:$8 sps:$4 sm:$0xff]   ;;  %v3046_v17 = vld [vmem:[#allocation7 + $0x204] ss:$8 sps:$4 sm:$0xff]   ;;  %v3044_v18 = vld [vmem:[#allocation7 + $0x200] ss:$8 sps:$4 sm:$0xff]  }
 0x160   : > { %v678_v21 = vpop.f32.mrf.mxu0  ;;  %v918_v22 = vpop.f32.mrf.mxu1  ;;  %v3047_v20 = vld [vmem:[#allocation7 + $0x2f0] ss:$8 sps:$4 sm:$0xff]  }
 0x161   : > { %v684_v27 = vadd.f32 %v678_v21, %v420_v16  ;;  %v925_v31 = vadd.f32 %v918_v22, %v683_v24  ;;  %v3041_v16 = vld [vmem:[#allocation7 + $0x210] ss:$8 sps:$4 sm:$0xff]   ;;  %v3052_v21 = vld [vmem:[#allocation7 + $0x2e4] ss:$8 sps:$4 sm:$0xff]   ;;  %v3050_v22 = vld [vmem:[#allocation7 + $0x2e0] ss:$8 sps:$4 sm:$0xff]  }
 0x162   : > { %v920_v29 = vpop.f32.mrf.mxu1  ;;  %v3053_v24 = vld [vmem:[#allocation7 + $0x2d0] ss:$8 sps:$4 sm:$0xff]  }
 0x163   : > { %v926_v36 = vadd.f32 %v920_v29, %v684_v27  ;;  %v3061_v27 = vld [vmem:[#allocation7 + $0x2b4] ss:$8 sps:$4 sm:$0xff]   ;;  %v3064_v29 = vld [vmem:[#allocation7 + $0x2a4] ss:$8 sps:$4 sm:$0xff]  }
 0x19a   : > { %v1177_v25 = vpop.f32.mrf.mxu0 }
 0x19b   : > { %v1186_v28 = vadd.f32 %v1177_v25, %v923_v23  ;;  %v3055_v23 = vld [vmem:[#allocation7 + $0x2d4] ss:$8 sps:$4 sm:$0xff]   ;;  %v3058_v25 = vld [vmem:[#allocation7 + $0x2c4] ss:$8 sps:$4 sm:$0xff]  }
 0x19c   : > { %v1179_v30 = vpop.f32.mrf.mxu0 }
 0x19d   : > { %v1187_v32 = vadd.f32 %v1179_v30, %v924_v26  ;;  %v1190_v37 = vmax.f32 %v1186_v28, 0.0  ;;  %v3056_v26 = vld [vmem:[#allocation7 + $0x2c0] ss:$8 sps:$4 sm:$0xff]   ;;  %v3059_v28 = vld [vmem:[#allocation7 + $0x2b0] ss:$8 sps:$4 sm:$0xff]  }
 0x19e   : > { %v1181_v34 = vpop.f32.mrf.mxu0  ;;  %v3062_v30 = vld [vmem:[#allocation7 + $0x2a0] ss:$8 sps:$4 sm:$0xff]  }
 0x19f   : > { %v1188_v38 = vadd.f32 %v1181_v34, %v925_v31  ;;  %v1191_v40 = vmax.f32 %v1187_v32, 0.0  ;;  %v1701_v43 = vrot.slane %v1190_v37, 1  ;;  %v1206_v47 = vrot.slane %v1190_v37, 7  ;;  %v3067_v31 = vld [vmem:[#allocation7 + $0x294] ss:$8 sps:$4 sm:$0xff]  }
 0x1a0   : > { %v1183_v39 = vpop.f32.mrf.mxu0  ;;  %v3065_v32 = vld [vmem:[#allocation7 + $0x290] ss:$8 sps:$4 sm:$0xff]   ;;  %v3070_v34 = vld [vmem:[#allocation7 + $0x284] ss:$8 sps:$4 sm:$0xff]  }
 0x1a1   : > { %v1192_v41 = vmax.f32 %v1188_v38, 0.0  ;;  %v1189_v42 = vadd.f32 %v1183_v39, %v926_v36  ;;  %v1207_v48 = vrot.slane %v1191_v40, 7  ;;  %v1702_v51 = vrot.slane %v1191_v40, 1  ;;  %v3068_v36 = vld [vmem:[#allocation7 + $0x280] ss:$8 sps:$4 sm:$0xff]  }
 0x1a3   : > { %v1208_v44 = vrot.slane %v1192_v41, 7  ;;  %v1703_v45 = vrot.slane %v1192_v41, 1  ;;  %v1193_v46 = vmax.f32 %v1189_v42, 0.0  ;;  %v1459_v57 = vpack.c.bf16 %v1192_v41, %v1190_v37 }
 0x1a5   : > { %v3519_v49 = vsel %vm931_vm4, %v1701_v43, %v1703_v45  ;;  %v3523_v50 = vsel %vm931_vm4, %v1703_v45, %v1701_v43  ;;  %v1209_v53 = vrot.slane %v1193_v46, 7  ;;  %v1704_v54 = vrot.slane %v1193_v46, 1 }
 0x1a6   : > { %v2669_v52 = vpack.c.bf16 %v3523_v50, %v3519_v49  ;;  %v1210_v55 = vsel %vm427_vm0, %v1206_v47, %v1208_v44  ;;  %v1212_v56 = vsel %vm427_vm0, %v1208_v44, %v1206_v47  ;;  %v1460_v58 = vpack.c.bf16 %v1193_v46, %v1191_v40  ;;  %v1194_v40 = vld [vmem:[%s3685_s4] sm:$0x3] }
 0x1a7   : > { %v1211_v59 = vsel %vm427_vm0, %v1207_v48, %v1209_v53  ;;  %v1213_v61 = vsel %vm427_vm0, %v1209_v53, %v1207_v48  ;;  %v1706_v62 = vsel %vm931_vm4, %v1702_v51, %v1704_v54  ;;  %v1708_v63 = vsel %vm931_vm4, %v1704_v54, %v1702_v51 }
 0x1a8   : > { %1686 = vmatprep.mubr.bf16.mxu0 %v1460_v58  ;;  %v2596_v0 = vpack.c.bf16 %v1211_v59, %v1213_v61  ;;  %v2599_v2 = vpack.c.bf16 %v1210_v55, %v1212_v56  ;;  %v2666_v4 = vpack.c.bf16 %v1708_v63, %v1706_v62  ;;  %v1199_v42 = vrot.slane %v1194_v40, %v3508_v10 }
 0x1a9   : > { %1687 = vmatmul.mubr.bf16.vlgmr.msra.gmra.mxu0 %v1459_v57  ;;  %v1203_v44 = vrot.slane %v1194_v40, %v419_v12  ;;  %vm2318_vm0 = vcmask 916480  }
 0x1aa   : > { %2597 = vmatprep.mubr.msk.bf16.mxu1 %vm3462_vm3, %v2596_v0 }
 0x1ab   : > { %2600 = vmatmul.mubr.msk.bf16.vlgmr.msra.gmra.mxu1 %vm3462_vm3, %v2599_v2 }
 0x1ac   : > { %1909 = vmatpush1.bf16.msra.mxu1 %v3023_v1  ;;  %2667 = vmatprep.mubr.msk.bf16.mxu1 %vm3491_vm6, %v2666_v4 }
 0x1ad   : > { %1910 = vmatprep.subr.bf16.mxu1 %v3028_v3 }
 0x1b0   : > { %1911 = vmatpush1.bf16.msra.mxu1 %v3026_v5 }
 0x1b1   : > { %1912 = vmatprep.subr.bf16.mxu1 %v3031_v6 }
 0x1b4   : > { %1913 = vmatpush1.bf16.msra.mxu1 %v3029_v8 }
 0x1b5   : > { %1914 = vmatprep.subr.bf16.mxu1 %v3034_v7 }
 0x1b8   : > { %1915 = vmatpush1.bf16.msra.mxu1 %v3032_v9 }
 0x1b9   : > { %1916 = vmatprep.subr.bf16.mxu1 %v3037_v11 }
 0x1bc   : > { %1917 = vmatpush1.bf16.msra.mxu1 %v3035_v13 }
 0x1bd   : > { %1918 = vmatprep.subr.bf16.mxu1 %v3040_v60 }
 0x1c0   : > { %1919 = vmatpush1.bf16.msra.mxu1 %v3038_v14  ;;  %v2123_v14 = vld [vmem:[%s3686_s5 + $0x8] sm:$0xff] }
 0x1c1   : > { %1920 = vmatprep.subr.bf16.mxu1 %v3043_v15  ;;  %v3244_v15 = vmov 0.0  }
 0x1c2   : > { %2687 = vmatprep.subr.mxu0 %v3244_v15  ;;  %2691 = vmatprep.mubr.msk.f32.mxu0 %vm3245_vm7, %v3244_v15 }
 0x1c3   : > { %2688 = vmatpush3.msra.mxu0 %v2123_v14 }
 0x1c4   : > { %1921 = vmatpush1.bf16.msra.mxu1 %v3041_v16  ;;  %v2122_v16 = vld [vmem:[%s3686_s5] sm:$0xff]  ;;  %2689 = vmatprep.subr.mxu0 %v3244_v15 }
 0x1c5   : > { %1922 = vmatprep.subr.bf16.mxu1 %v3046_v17  ;;  %2690 = vmatpush3.msra.mxu0 %v2122_v16  ;;  %v2199_v17 = vld [vmem:[%s3688_s7] sm:$0xf] }
 0x1c8   : > { %1923 = vmatpush1.bf16.msra.mxu1 %v3044_v18 }
 0x1c9   : > { %1924 = vmatprep.subr.bf16.mxu1 %v3049_v19 }
 0x1cc   : > { %1925 = vmatpush2.bf16.msra.mxu1 %v3047_v20 }
 0x1cd   : > { %1926 = vmatprep.subr.bf16.mxu1 %v3052_v21 }
 0x1d0   : > { %1927 = vmatpush2.bf16.msra.mxu1 %v3050_v22 }
 0x1d1   : > { %1928 = vmatprep.subr.bf16.mxu1 %v3055_v23 }
 0x1d4   : > { %1929 = vmatpush2.bf16.msra.mxu1 %v3053_v24  ;;  %v3246_v24 = vmov 1983009808  }
 0x1d5   : > { %1930 = vmatprep.subr.bf16.mxu1 %v3058_v25  ;;  %v2015_v25 = vunpack.c.l.s4 %v3246_v24 }
 0x1d8   : > { %1931 = vmatpush2.bf16.msra.mxu1 %v3056_v26 }
 0x1d9   : > { %1932 = vmatprep.subr.bf16.mxu1 %v3061_v27 }
 0x1dc   : > { %1933 = vmatpush2.bf16.msra.mxu1 %v3059_v28  ;;  %v2016_v28 = vunpack.c.0.s8 %v2015_v25 }
 0x1dd   : > { %1934 = vmatprep.subr.bf16.mxu1 %v3064_v29 }
 0x1e0   : > { %1935 = vmatpush2.bf16.msra.mxu1 %v3062_v30 }
 0x1e1   : > { %1936 = vmatprep.subr.bf16.mxu1 %v3067_v31 }
 0x1e4   : > { %1937 = vmatpush2.bf16.msra.mxu1 %v3065_v32  ;;  %v2019_v32 = vsub.s32 %v2016_v28, %v3443_v35 }
 0x1e5   : > { %1938 = vmatprep.subr.bf16.mxu1 %v3070_v34  ;;  %v3247_v34 = vmov 1934713408  }
 0x1e8   : > { %1939 = vmatpush2.bf16.msra.mxu1 %v3068_v36  ;;  %v2047_v36 = vunpack.c.l.s4 %v3247_v34 }
 0x1e9   : > { %2694 = vmatprep.subr.mxu1 %v3244_v15 }
 0x1eb   : > { %2670 = vmatmul.mubr.msk.bf16.vlgmr.msra.gmra.mxu1 %vm3491_vm6, %v2669_v52 }
 0x1ec   : > { %2696 = vmatprep.mubr.msk.f32.mxu1 %vm3245_vm7, %v3244_v15  ;;  %2695 = vmatpush3.msk.msra.mxu1 %vm2205_vm8, %v2199_v17  ;;  %v2124_v17 = vld [vmem:[%s3687_s6] sm:$0x1] }
 0x269   : > { %v1688_v39 = vpop.f32.mrf.mxu0 }
 0x26b   : > { %v1446_v37 = vpop.f32.mrf.mxu1  ;;  %v1690_v43 = vpop.f32.mrf.mxu0 }
 0x26c   : > { %v1455_v46 = vadd.f32 %v1446_v37, %v1199_v42 }
 0x26d   : > { %v1448_v38 = vpop.f32.mrf.mxu1  ;;  %v1692_v48 = vpop.f32.mrf.mxu0 }
 0x26e   : > { %v1456_v49 = vadd.f32 %v1448_v38, %v1203_v44  ;;  %v1697_v52 = vadd.f32 %v1688_v39, %v1455_v46 }
 0x26f   : > { %v1450_v41 = vpop.f32.mrf.mxu1  ;;  %v1694_v54 = vpop.f32.mrf.mxu0 }
 0x270   : > { %v1457_v47 = vadd.f32 %v1450_v41, %v1199_v42  ;;  %v1698_v57 = vadd.f32 %v1690_v43, %v1456_v49 }
 0x271   : > { %v1452_v45 = vpop.f32.mrf.mxu1 }
 0x272   : > { %v1458_v50 = vadd.f32 %v1452_v45, %v1203_v44  ;;  %v1699_v53 = vadd.f32 %v1692_v48, %v1457_v47  ;;  %v2048_v45 = vunpack.c.0.s8 %v2047_v36 }
 0x274   : > { %v1700_v59 = vadd.f32 %v1694_v54, %v1458_v50 }
 0x2ab   : > { %v1942_v33 = vpop.f32.mrf.mxu1 }
 0x2ac   : > { %v3556_v56 = vadd.f32 %v1942_v33, %v1697_v52 }
 0x2ad   : > { %v1944_v51 = vpop.f32.mrf.mxu1 }
 0x2ae   : > { %v3560_v12 = vadd.f32 %v1944_v51, %v1698_v57 }
 0x2af   : > { %v1946_v55 = vpop.f32.mrf.mxu1 }
 0x2b0   : > { %v3558_v58 = vadd.f32 %v1946_v55, %v1699_v53  ;;  %v2051_v53 = vsub.s32 %v2048_v45, %v3443_v35 }
 0x2b1   : > { %v1948_v61 = vpop.f32.mrf.mxu1 }
 0x2b2   : > { %v1955_v62 = vadd.f32 %v3558_v58, %v3556_v56  ;;  %v3564_v63 = vadd.f32 %v1948_v61, %v1700_v59 }
 0x2b4   : > { %v1956_v0 = vrot.slane %v1955_v62, 4  ;;  %v1962_v1 = vadd.f32 %v3564_v63, %v3560_v12 }
 0x2b6   : > { %v1957_v2 = vadd.f32 %v1956_v0, %v1955_v62  ;;  %v1963_v3 = vrot.slane %v1962_v1, 4 }
 0x2b8   : > { %v1958_v4 = vrot.slane %v1957_v2, 2  ;;  %v1964_v6 = vadd.f32 %v1963_v3, %v1962_v1 }
 0x2ba   : > { %v1959_v5 = vadd.f32 %v1958_v4, %v1957_v2  ;;  %v1965_v9 = vrot.slane %v1964_v6, 2 }
 0x2bc   : > { %v1960_v8 = vrot.slane %v1959_v5, 1  ;;  %v1966_v11 = vadd.f32 %v1965_v9, %v1964_v6 }
 0x2be   : > { %v3568_v7 = vadd.f32 %v1960_v8, %v1959_v5  ;;  %v1967_v13 = vrot.slane %v1966_v11, 1 }
 0x2c0   : > { %1976 = vrot.lane.b32.xlu1 %v3568_v7, %s3237_s20  ;;  %1970 = vrot.lane.b32.xlu0 %v3568_v7, %s3238_s19  ;;  %v1968_v60 = vadd.f32 %v1967_v13, %v1966_v11 }
 0x2c4   : > { %1979 = vrot.lane.b32.xlu1 %v3568_v7, %s3239_s29  ;;  %1973 = vrot.lane.b32.xlu0 %v3568_v7, %s3240_s26 }
 0x2c8   : > { %1985 = vrot.lane.b32.xlu1 %v3568_v7, %s3241_s22  ;;  %1982 = vrot.lane.b32.xlu0 %v3568_v7, %s3242_s1 }
 0x2cc   : > { %1988 = vrot.lane.b32.xlu0 %v3568_v7, %s3243_s24  ;;  %1992 = vrot.lane.b32.xlu1 %v1968_v60, %s3238_s19 }
 0x2d0   : > { %1995 = vrot.lane.b32.xlu0 %v1968_v60, %s3240_s26  ;;  %1998 = vrot.lane.b32.xlu1 %v1968_v60, %s3237_s20 }
 0x2d4   : > { %2001 = vrot.lane.b32.xlu0 %v1968_v60, %s3239_s29  ;;  %2004 = vrot.lane.b32.xlu1 %v1968_v60, %s3242_s1 }
 0x2d8   : > { %2007 = vrot.lane.b32.xlu0 %v1968_v60, %s3241_s22  ;;  %2010 = vrot.lane.b32.xlu1 %v1968_v60, %s3243_s24 }
 0x332   : > { %v1977_v18 = vpop.permute.xlu1 %1976  ;;  %v1971_v19 = vpop.permute.xlu0 %1970 }
 0x333   : > { %v2021_v39 = vcombine.low %v1971_v19, %v1977_v18 }
 0x335   : > { %v2028_v48 = vrot.slane %v2021_v39, %v2019_v32 }
 0x336   : > { %v1980_v20 = vpop.permute.xlu1 %1979  ;;  %v1974_v21 = vpop.permute.xlu0 %1973 }
 0x337   : > { %v2013_v37 = vcombine.low %v3568_v7, %v1974_v21 }
 0x339   : > { %v2020_v46 = vrot.slane %v2013_v37, %v2019_v32 }
 0x33a   : > { %v1986_v22 = vpop.permute.xlu1 %1985  ;;  %v1983_v23 = vpop.permute.xlu0 %1982 }
 0x33b   : > { %v2029_v38 = vcombine.low %v1980_v20, %v1986_v22  ;;  %v2045_v54 = vcombine.low %v2020_v46, %v2028_v48  ;;  %v2200_v22 = vld [vmem:[%s3689_s8] sm:$0x1] }
 0x33d   : > { %v2036_v47 = vrot.slane %v2029_v38, %v2019_v32  ;;  %v2052_v1 = vrot.slane %v2045_v54, %v2051_v53 }
 0x33e   : > { %v1989_v26 = vpop.permute.xlu0 %1988  ;;  %v1993_v27 = vpop.permute.xlu1 %1992 }
 0x33f   : > { %v2037_v29 = vcombine.low %v1983_v23, %v1989_v26 }
 0x341   : > { %v2044_v40 = vrot.slane %v2037_v29, %v2019_v32 }
 0x342   : > { %v1996_v30 = vpop.permute.xlu0 %1995  ;;  %v1999_v31 = vpop.permute.xlu1 %1998 }
 0x343   : > { %v2062_v41 = vcombine.low %v1968_v60, %v1996_v30  ;;  %v2070_v42 = vcombine.low %v1993_v27, %v1999_v31  ;;  %v2053_v33 = vcombine.low %v2036_v47, %v2044_v40 }
 0x345   : > { %v2069_v49 = vrot.slane %v2062_v41, %v2019_v32  ;;  %v2077_v50 = vrot.slane %v2070_v42, %v2019_v32  ;;  %v2060_v59 = vrot.slane %v2053_v33, %v2051_v53 }
 0x346   : > { %v2002_v43 = vpop.permute.xlu0 %2001  ;;  %v2005_v44 = vpop.permute.xlu1 %2004 }
 0x347   : > { %v2094_v61 = vcombine.low %v2069_v49, %v2077_v50  ;;  %v2061_v3 = vcombine.low %v2052_v1, %v2060_v59  ;;  %v3075_v50 = vld [vmem:[%s3433_s25] sm:$0xff] }
 0x349   : > { %v2101_v4 = vrot.slane %v2094_v61, %v2051_v53  ;;  %v2112_v8 = vsel %vm2111_vm9, %v2061_v3, 0.0 }
 0x34a   : > { %v2008_v51 = vpop.permute.xlu0 %2007  ;;  %v2011_v52 = vpop.permute.xlu1 %2010 }
 0x34b   : > { %v2078_v55 = vcombine.low %v2002_v43, %v2008_v51  ;;  %v2086_v57 = vcombine.low %v2005_v44, %v2011_v52  ;;  %v3076_v51 = vld [vmem:[%s3433_s25 + $0x8] sm:$0xff] }
 0x34d   : > { %v2085_v62 = vrot.slane %v2078_v55, %v2019_v32  ;;  %v2093_v0 = vrot.slane %v2086_v57, %v2019_v32 }
 0x34f   : > { %v2102_v2 = vcombine.low %v2085_v62, %v2093_v0 }
 0x351   : > { %v2109_v5 = vrot.slane %v2102_v2, %v2051_v53  ;;  %v3077_v53 = vld [vmem:[%s3433_s25 + $0x10] sm:$0xff] }
 0x353   : > { %v2110_v6 = vcombine.low %v2101_v4, %v2109_v5 }
 0x355   : > { %v2113_v7 = vsel %vm2111_vm9, %v2110_v6, 0.0 }
 0x356   : > { %v2114_v9 = vadd.f32 %v2113_v7, %v2112_v8 }
 0x358   : > { %v2115_v35 = vrot.slane %v2114_v9, 4 }
 0x35a   : > { %v2116_v11 = vadd.f32 %v2115_v35, %v2114_v9 }
 0x35c   : > { %v2117_v13 = vrot.slane %v2116_v11, 2 }
 0x35e   : > { %v2118_v60 = vadd.f32 %v2117_v13, %v2116_v11 }
 0x360   : > { %v2119_v14 = vrot.slane %v2118_v60, 1 }
 0x362   : > { %v2120_v15 = vadd.f32 %v2119_v14, %v2118_v60 }
 0x364   : > { %v2121_v16 = vmul.f32 0.00390625, %v2120_v15 }
 0x366   : > { %2692 = vmatmul.mubr.msk.f32.vlgmr.msra.gmra.mxu0 %vm2111_vm9, %v2121_v16 }
 0x426   : > { %v2194_v18 = vpop.f32.mrf.mxu0 }
 0x427   : > { %v2195_v19 = vadd.f32 %v2194_v18, %v2124_v17 }
 0x428   : > { %v2693_v20 = vpop.f32.mrf.mxu0 }
 0x429   : > { %v2198_v21 = vmax.f32 %v2195_v19, 0.0 }
 0x42b   : > { %2697 = vmatmul.mubr.msk.f32.vlgmr.msra.gmra.mxu1 %vm2201_vm10, %v2198_v21 }
 0x4eb   : > { %v2275_v23 = vpop.f32.mrf.mxu1 }
 0x4ec   : > { %v2276_v24 = vadd.f32 %v2275_v23, %v2200_v22 }
 0x4ed   : > { %v2698_v25 = vpop.f32.mrf.mxu1 }
 0x4ee   : > { %v2674_v26 = vmul.f32 -1.442695, %v2276_v24 }
 0x4f0   : > { %3071 = vpow2.f32 %v2674_v26 }
 0x4fd   : > { %v3072_v27 = vpop.eup %3071 }
 0x4fe   : > { %v2282_v28 = vadd.f32 1.0, %v3072_v27 }
 0x500   : > { %3073 = vrcp.f32 %v2282_v28 }
 0x50d   : > { %v3074_v29 = vpop.eup %3073 }
 0x50e   : > { %2289 = vrot.lane.b32.xlu1 %v3074_v29, %s3241_s22  ;;  %2286 = vrot.lane.b32.xlu0 %v3074_v29, %s3243_s24 }
 0x512   : > { %2295 = vrot.lane.b32.xlu1 %v3074_v29, %s3239_s29  ;;  %2292 = vrot.lane.b32.xlu0 %v3074_v29, %s3242_s1 }
 0x516   : > { %2301 = vrot.lane.b32.xlu1 %v3074_v29, %s3240_s26  ;;  %2298 = vrot.lane.b32.xlu0 %v3074_v29, %s3237_s20  ;;  %s2681_s20 = sshll.u32 %s3321_s13, 9  ;;  %s2337_s13 = scalar_lea.sflag [#allocation4], %s3427_s3 }
 0x517   : > { %s3631_s1 = scalar_lea.hbm %s3690_s9, %s2681_s20 }
 0x51a   : > { %2304 = vrot.lane.b32.xlu0 %v3074_v29, %s3238_s19  ;;  %s379_s19 = scalar_lea.vmem [#allocation8], %s2451_s23 }
 0x51b   : > { %s2350_s29 = sshll.u32 %s379_s19, 4  ;;  %s3637_s29 = int_to_ptr.vmem [resolvable:$true] %s2350_s29 }
 0x51c   : > { %s3159_s23 = scalar_lea.vmem %s3637_s29, 512  ;;  %p3166_p6 = scmp.lt.s32.totalorder %s3637_s29, %s3164_s15 }
 0x51d   : > { %p3160_p11 = scmp.ne.s32.totalorder %s3637_s29, %s3159_s23 }
 0x51f   : > { %p3161_p1 = pnand %p3160_p11, %p3715_p10 }
 0x521   : > { %p3162_p2 = pneg %p3161_p1 }
 0x580   : > { %v2290_v30 = vpop.permute.xlu1 %2289  ;;  %v2287_v31 = vpop.permute.xlu0 %2286 }
 0x581   : > { %v2307_v32 = vsel %vm2111_vm9, %v3074_v29, %v2287_v31 }
 0x582   : > { %v2309_v36 = vsel %vm2308_vm11, %v2307_v32, %v2290_v30 }
 0x584   : > { %v2296_v34 = vpop.permute.xlu1 %2295  ;;  %v2293_v37 = vpop.permute.xlu0 %2292 }
 0x585   : > { %v2311_v38 = vsel %vm2310_vm12, %v2309_v36, %v2293_v37 }
 0x586   : > { %v2313_v39 = vsel %vm2312_vm13, %v2311_v38, %v2296_v34 }
 0x588   : > { %v2299_v40 = vpop.permute.xlu0 %2298  ;;  %v2302_v41 = vpop.permute.xlu1 %2301 }
 0x589   : > { %v2315_v42 = vsel %vm2314_vm14, %v2313_v39, %v2299_v40 }
 0x58a   : > { %v2317_v43 = vsel %vm2316_vm15, %v2315_v42, %v2302_v41 }
 0x58c   : > { %v2305_v44 = vpop.permute.xlu0 %2304 }
 0x58d   : > { %v2319_v45 = vsel %vm2318_vm0, %v2317_v43, %v2305_v44 }
 0x58e   : > { %v2323_v46 = vrot.slane %v2319_v45, %v3508_v10 }
 0x590   : > { %v2324_v47 = vmul.f32 %v2323_v46, %v3556_v56  ;;  %v2325_v48 = vmul.f32 %v2323_v46, %v3560_v12  ;;  %v2326_v33 = vmul.f32 %v2323_v46, %v3558_v58  ;;  %v2327_v49 = vmul.f32 %v2323_v46, %v3564_v63  ;;  %v3078_v56 = vld [vmem:[%s3433_s25 + $0x18] sm:$0xff]  ;;  %s3165_s25 = scalar_lea.vmem %s3164_s15, 1024 }
 0x591   : > { %p3167_p12 = scmp.lt.s32.totalorder %s3165_s25, %s3159_s23 }
 0x592   : > { %v2328_v10 = vadd.f32 %v3075_v50, %v2324_v47  ;;  %v2329_v52 = vadd.f32 %v3076_v51, %v2325_v48  ;;  %v2330_v54 = vadd.f32 %v3077_v53, %v2326_v33  ;;  %v2331_v55 = vadd.f32 %v3078_v56, %v2327_v49 }
 0x593   : > { %p3168_p7 = por %p3167_p12, %p3166_p6 }
 0x594   : > { %2332 = vst [vmem:[%s379_s19] sm:$0xff] %v2328_v10  ;;  %2333 = vst [vmem:[%s379_s19 + $0x8] sm:$0xff] %v2329_v52 }
 0x595   : > { %2334 = vst [vmem:[%s379_s19 + $0x10] sm:$0xff] %v2330_v54  ;;  %2335 = vst [vmem:[%s379_s19 + $0x18] sm:$0xff] %v2331_v55  ;;  %p3169_p9 = pnand %p3168_p7, %p3162_p2 }
 0x597   : > { %3172 = shalt.err (!%p3169_p9)
}
 0x598   : > { %s3173_s17 = scalar_lea.hbm %s3631_s1, 512  ;;  %s3177_s20 = scalar_lea.hbm %s3690_s9, 1024 }
 0x599   : > { %p3174_p13 = scmp.ne.s32.totalorder %s3631_s1, %s3173_s17  ;;  %p3178_p4 = scmp.lt.s32.totalorder %s3631_s1, %s3690_s9 }
 0x59a   : > { %p3179_p8 = scmp.lt.s32.totalorder %s3177_s20, %s3173_s17 }
 0x59b   : > { %p3175_p5 = pnand %p3174_p13, %p3715_p10 }
 0x59c   : > { %p3180_p3 = por %p3179_p8, %p3178_p4 }
 0x59d   : > { %p3176_p0 = pneg %p3175_p5 }
 0x59f   : > { %p3181_p11 = pnand %p3180_p3, %p3176_p0 }
 0x5a1   : > { %3184 = shalt.err (!%p3181_p11)
}
 0x5a2   : > { %s3249_s22 = smov 256  }
 0x5a3   : > { %2709 = dma.vmem_to_hbm [thread:$0]  (%p3715_p10), %s3637_s29, 512, %s3631_s1, %s2337_s13, %s3249_s22, %s3249_s22, %s3243_s24  }
 0x5a4 PF: > { %s2365_s23 = sand.u32 1, %s3215_s30   ;;  %p3716_p1 = scmp.ne.s32.totalorder %s3698_s16, 0 }
 0x5a5   : > { %p3717_p2 = scmp.ge.s32.totalorder %s3227_s12, 2  ;;  %s2366_s27 = scalar_lea.sflag [#allocation4], %s2365_s23 }
 0x5a7   : > { %p2723_p6 = pnand %p3717_p2, %p3716_p1 }
 0x5a9   : > { %p2724_p12 = pneg %p2723_p6 }
 0x5ab   : > { %3210 = dma.done.wait (%p2724_p12), %s2366_s27, 512  }
 0x5ac   : > { %3212 = vsyncadd (%p2724_p12), %s2366_s27, 4294966784  ;;  %s3718_s21 = sld [smem:[#allocation12_spill]]  ;;  %p23_p7 = scmp.ge.s32.totalorder %s3372_s18, 4  }
 0x5ad   : > { %s3719_s30 = smov %s3219_s10  ;;  %s3720_s10 = smov %s3223_s11 }
 0x5ae   : > { %s3722_s12 = smov %s3372_s18  ;;  %25 = sbr.rel (!%p23_p7) target bundleno = 9 (0x9), region = 113 }
 0x5b2   : > { %s3721_s11 = smov %s3718_s21 }
 0x5b3   :  { %2371 = vsyncpa [#allocation3], 1 }
 0x5b4   :  { %2373 = vsyncpa [#allocation3 + $0x1], 1 }
 0x5b5   :  { %2374 = vsyncpa [#allocation6], 1 }
 0x5b6   :  { %2375 = vsyncpa [#allocation4], 1 }
 0x5b7   :  { %2377 = vsyncpa [#allocation4 + $0x1], 1 }

</bundles_post_ra>
